<compile_context>
chip_gen: v5e
topology: v5e:2x2
jax: 0.10.0
libtpu: 0.0.40
codegen_flags: <defaults>
</compile_context>

<pallas_src>
import functools
import math

import jax
import jax.numpy as jnp
from jax import lax
from jax.experimental import pallas as pl
from jax.experimental.pallas import tpu as pltpu


def _round_up(x: int, m: int) -> int:
    return ((x + m - 1) // m) * m


def _choose_bn(n: int, block_cols: int) -> int:
    """Column (lane-axis) tile: large, 128-aligned, and >=2 grid steps when possible."""
    bn = min(block_cols, _round_up(n, 128))
    if n > 128 and pl.cdiv(n, bn) < 2:
        bn = _round_up(pl.cdiv(n, 2), 128)   # let v7x's 2 TensorCores both work
    return max(128, bn)


def _siren_fused_kernel(x_ref, *refs, dim_in, n_mid, w0_first):
    """Whole SirenNet forward on one (features, bn) column tile, fully in VMEM.

    refs = w_first, b_first, (w_i, b_i) * n_mid, w_final, b_final, out_ref
    Weights are [out, in] (torch layout); biases are [out, 1]; activations are
    feature-major [features, bn] so N sits on the lane axis.
    """
    o_ref = refs[-1]
    p = refs[:-1]

    # ---- layer 0: sin(w0_initial * (W0 x + b0)) ----  f32 on the VPU.
    x = x_ref[...].astype(jnp.float32)              # [dim_in, bn]
    w_first = p[0][...].astype(jnp.float32)         # [dim_hidden, dim_in]
    if dim_in <= 8:
        # Tiny contraction (K=2): broadcast FMAs instead of a ~empty MXU pass.
        acc = w_first[:, 0:1] * x[0:1, :]
        for k in range(1, dim_in):
            acc = acc + w_first[:, k:k + 1] * x[k:k + 1, :]
    else:
        acc = jnp.dot(w_first, x, preferred_element_type=jnp.float32)
    acc = acc + p[1][...]
    h = jnp.sin(w0_first * acc)                     # [dim_hidden, bn] f32

    # ---- hidden sine layers: sin(W h + b) ----  single-pass bf16 MXU, f32 acc.
    # NOTE: the reference Siren.forward only multiplies by w0 when is_first,
    # so hidden layers carry no extra w0 factor.
    for i in range(n_mid):
        w_ref = p[2 + 2 * i]
        b_ref = p[3 + 2 * i]
        acc = jnp.dot(w_ref[...].astype(jnp.bfloat16), h.astype(jnp.bfloat16),
                      preferred_element_type=jnp.float32)
        h = jnp.sin(acc + b_ref[...])

    # ---- final linear + fused postprocess clamp((y + 1)/2, 0, 1) ----
    wf_ref, bf_ref = p[-2], p[-1]
    y = jnp.dot(wf_ref[...].astype(jnp.bfloat16), h.astype(jnp.bfloat16),
                preferred_element_type=jnp.float32)
    y = y + bf_ref[...]
    y = jnp.clip((y + 1.0) * 0.5, 0.0, 1.0)
    o_ref[...] = y.astype(o_ref.dtype)


def siren_net_forward(params, x, *, w0=1.0, w0_initial=30.0, out_size=None,
                      block_cols=8192):
    """Fused Pallas forward matching SirenNet.forward(x, out_size) + postprocess.

    params: list of (W [dout, din], b [dout]) in torch nn.Linear layout.
    x: [N, dim_in] coordinates.  (Module-level w0 only affects init in the
    reference; the forward math only uses w0_initial on the is_first layer.)
    """
    del w0  # only used at init time in the reference module
    n_layers = len(params)
    assert n_layers >= 2
    N, dim_in = x.shape
    dim_hidden = params[0][0].shape[0]
    dim_out = params[-1][0].shape[0]
    n_mid = n_layers - 2

    # Feature-major: N maps to the 128-lane axis inside the kernel.
    x_t = x.T                                        # [dim_in, N]

    bn = _choose_bn(N, block_cols)
    grid = (pl.cdiv(N, bn),)

    flat_params = []
    in_specs = [pl.BlockSpec((dim_in, bn), lambda j: (0, j))]   # x column tile
    for i, (w, b) in enumerate(params):
        # Layer 0 stays f32 (VPU path); other weights pre-cast to bf16 for the MXU.
        w_arr = w.astype(jnp.float32) if i == 0 else w.astype(jnp.bfloat16)
        b_arr = b.reshape(-1, 1).astype(jnp.float32)
        flat_params += [w_arr, b_arr]
        in_specs += [pl.BlockSpec(w_arr.shape, lambda j: (0, 0)),   # resident weight
                     pl.BlockSpec(b_arr.shape, lambda j: (0, 0))]   # resident bias

    kernel = functools.partial(_siren_fused_kernel, dim_in=dim_in, n_mid=n_mid,
                               w0_first=float(w0_initial))

    # VMEM budget from actual usage: double-buffered x/out column tiles,
    # resident params, and in-flight f32 activation slabs.  Cap << v7x 64 MiB.
    params_bytes = sum(int(a.size) * a.dtype.itemsize for a in flat_params)
    est = (2 * (dim_in + dim_out) * bn * 4          # double-buffered I/O tiles
           + 4 * dim_hidden * bn * 4                # live activation slabs
           + 2 * params_bytes)
    vmem_limit = int(min(48 * 1024 * 1024, max(4 * 1024 * 1024, 4 * est)))

    y_t = pl.pallas_call(
        kernel,
        out_shape=jax.ShapeDtypeStruct((dim_out, N), x.dtype),
        grid_spec=pltpu.PrefetchScalarGridSpec(
            num_scalar_prefetch=0,
            grid=grid,
            in_specs=in_specs,
            out_specs=pl.BlockSpec((dim_out, bn), lambda j: (0, j)),
        ),
        compiler_params=pltpu.CompilerParams(
            dimension_semantics=("parallel",),       # column tiles shard across TCs
            vmem_limit_bytes=vmem_limit,
        ),
    )(x_t, *flat_params)                             # y_t: [dim_out, N]

    if out_size is None:
        return y_t.T                                 # [N, dim_out] like the module
    c = dim_out
    if len(out_size) == 2:
        hh, ww = out_size                            # '(h w) c -> () c h w'
        return y_t.reshape(c, hh, ww)[None]
    if len(out_size) == 3:
        hh, ww, tt = out_size                        # '(h w t) c -> t c h w'
        return y_t.reshape(c, hh, ww, tt).transpose(3, 0, 1, 2)
    raise ValueError("wrong output size")


def siren_net_reference(params, x, *, w0_initial=30.0, match_kernel_precision=False):
    """Pure-JAX reference.  With match_kernel_precision=True it mirrors the
    kernel's operand dtypes (f32 layer 0, bf16 MXU operands elsewhere)."""
    n_layers = len(params)
    h = x
    for i, (w, b) in enumerate(params):
        if match_kernel_precision and i > 0:
            y = jnp.dot(h.astype(jnp.bfloat16), w.T.astype(jnp.bfloat16),
                        preferred_element_type=jnp.float32) + b
        else:
            y = jnp.dot(h, w.T, precision=lax.Precision.HIGHEST) + b
        if i == n_layers - 1:
            h = jnp.clip((y + 1.0) * 0.5, 0.0, 1.0)
        elif i == 0:
            h = jnp.sin(w0_initial * y)
        else:
            h = jnp.sin(y)
    return h


def init_siren_params(key, dim_in, dim_hidden, dim_out, n_layers, *, w0=1.0, c=6.0):
    """Mirror SirenNet's uniform(-w_std, w_std) init; weights stored [out, in]."""
    params = []
    keys = jax.random.split(key, 2 * n_layers)
    for i in range(n_layers):
        if i == 0:
            din, dout = dim_in, dim_hidden
            w_std = 1.0 / din                        # is_first init
        elif i == n_layers - 1:
            din, dout = dim_hidden, dim_out
            w_std = math.sqrt(c / din) / w0          # final layer init
        else:
            din, dout = dim_hidden, dim_hidden
            w_std = math.sqrt(c / din) / w0
        w = jax.random.uniform(keys[2 * i], (dout, din), jnp.float32, -w_std, w_std)
        b = jax.random.uniform(keys[2 * i + 1], (dout,), jnp.float32, -w_std, w_std)
        params.append((w, b))
    return params


if __name__ == "__main__":
    key = jax.random.PRNGKey(0)
    dim_in, dim_hidden, dim_out, n_layers = 2, 32, 3, 4
    H, W = 16, 16
    N = H * W                                        # 256 coordinate points
    w0, w0_initial, c = 1.0, 30.0, 6.0

    pkey, xkey = jax.random.split(key)
    params = init_siren_params(pkey, dim_in, dim_hidden, dim_out, n_layers, w0=w0, c=c)
    x = jax.random.uniform(xkey, (N, dim_in), jnp.float32, minval=-1.0, maxval=1.0)

    fwd = jax.jit(functools.partial(siren_net_forward, w0=w0, w0_initial=w0_initial))
    y = jax.block_until_ready(fwd(params, x))

    assert y.shape == (N, dim_out) and y.dtype == x.dtype

    # Tight check vs a reference using the SAME operand precision as the kernel.
    y_ref_matched = siren_net_reference(params, x, w0_initial=w0_initial,
                                        match_kernel_precision=True)
    err_m = float(jnp.max(jnp.abs(y - y_ref_matched)))
    assert jnp.allclose(y, y_ref_matched, atol=5e-3, rtol=5e-3), err_m

    # Sanity check vs the full-f32 reference (bounds the bf16 MXU quantization).
    y_ref = siren_net_reference(params, x, w0_initial=w0_initial)
    err_f = float(jnp.max(jnp.abs(y - y_ref)))
    assert jnp.allclose(y, y_ref, atol=2e-2, rtol=2e-2), err_f

    print("KERNEL_OK")
</pallas_src>

<mosaic_0001>
module attributes {stable_mosaic.version = 11 : i64} {
  func.func @_siren_fused_kernel(%arg0: i32, %arg1: memref<2x128xf32, #tpu.memory_space<vmem>>, %arg2: memref<32x2xf32, #tpu.memory_space<vmem>>, %arg3: memref<32x1xf32, #tpu.memory_space<vmem>>, %arg4: memref<32x32xbf16, #tpu.memory_space<vmem>>, %arg5: memref<32x1xf32, #tpu.memory_space<vmem>>, %arg6: memref<32x32xbf16, #tpu.memory_space<vmem>>, %arg7: memref<32x1xf32, #tpu.memory_space<vmem>>, %arg8: memref<3x32xbf16, #tpu.memory_space<vmem>>, %arg9: memref<3x1xf32, #tpu.memory_space<vmem>>, %arg10: memref<3x128xf32, #tpu.memory_space<vmem>>) attributes {dimension_semantics = [#tpu.dimension_semantics<parallel>], iteration_bounds = array<i64: 2>, scalar_prefetch = 0 : i64, scratch_operands = 0 : i64, tpu.core_type = #tpu.core_type<tc>, window_params = [{transform_indices = @transform_0, window_bounds = array<i64: 2, 128>}, {pipeline_mode = #tpu.pipeline_mode<synchronous>, transform_indices = @transform_1, window_bounds = array<i64: 32, 2>}, {pipeline_mode = #tpu.pipeline_mode<synchronous>, transform_indices = @transform_2, window_bounds = array<i64: 32, 1>}, {pipeline_mode = #tpu.pipeline_mode<synchronous>, transform_indices = @transform_3, window_bounds = array<i64: 32, 32>}, {pipeline_mode = #tpu.pipeline_mode<synchronous>, transform_indices = @transform_4, window_bounds = array<i64: 32, 1>}, {pipeline_mode = #tpu.pipeline_mode<synchronous>, transform_indices = @transform_5, window_bounds = array<i64: 32, 32>}, {pipeline_mode = #tpu.pipeline_mode<synchronous>, transform_indices = @transform_6, window_bounds = array<i64: 32, 1>}, {pipeline_mode = #tpu.pipeline_mode<synchronous>, transform_indices = @transform_7, window_bounds = array<i64: 3, 32>}, {pipeline_mode = #tpu.pipeline_mode<synchronous>, transform_indices = @transform_8, window_bounds = array<i64: 3, 1>}, {transform_indices = @transform_9, window_bounds = array<i64: 3, 128>}]} {
    %c0 = arith.constant 0 : index
    %c0_0 = arith.constant 0 : index
    %0 = vector.load %arg1[%c0, %c0_0] : memref<2x128xf32, #tpu.memory_space<vmem>>, vector<2x128xf32>
    %c0_1 = arith.constant 0 : index
    %c0_2 = arith.constant 0 : index
    %1 = vector.load %arg2[%c0_1, %c0_2] : memref<32x2xf32, #tpu.memory_space<vmem>>, vector<32x2xf32>
    %2 = vector.extract_strided_slice %1 {offsets = [0, 0], sizes = [32, 1], strides = [1, 1]} : vector<32x2xf32> to vector<32x1xf32>
    %3 = vector.extract_strided_slice %0 {offsets = [0, 0], sizes = [1, 128], strides = [1, 1]} : vector<2x128xf32> to vector<1x128xf32>
    %4 = vector.broadcast %2 : vector<32x1xf32> to vector<32x128xf32>
    %5 = vector.broadcast %3 : vector<1x128xf32> to vector<32x128xf32>
    %6 = arith.mulf %4, %5 : vector<32x128xf32>
    %7 = vector.extract_strided_slice %1 {offsets = [0, 1], sizes = [32, 1], strides = [1, 1]} : vector<32x2xf32> to vector<32x1xf32>
    %8 = vector.extract_strided_slice %0 {offsets = [1, 0], sizes = [1, 128], strides = [1, 1]} : vector<2x128xf32> to vector<1x128xf32>
    %9 = vector.broadcast %7 : vector<32x1xf32> to vector<32x128xf32>
    %10 = vector.broadcast %8 : vector<1x128xf32> to vector<32x128xf32>
    %11 = arith.mulf %9, %10 : vector<32x128xf32>
    %12 = arith.addf %6, %11 : vector<32x128xf32>
    %c0_3 = arith.constant 0 : index
    %c0_4 = arith.constant 0 : index
    %13 = vector.load %arg3[%c0_3, %c0_4] : memref<32x1xf32, #tpu.memory_space<vmem>>, vector<32x1xf32>
    %14 = vector.broadcast %13 : vector<32x1xf32> to vector<32x128xf32>
    %15 = arith.addf %12, %14 : vector<32x128xf32>
    %cst = arith.constant 3.000000e+01 : f32
    %16 = vector.broadcast %cst : f32 to vector<32x128xf32>
    %17 = arith.mulf %16, %15 : vector<32x128xf32>
    %18 = math.sin %17 : vector<32x128xf32>
    %c0_5 = arith.constant 0 : index
    %c0_6 = arith.constant 0 : index
    %19 = vector.load %arg4[%c0_5, %c0_6] : memref<32x32xbf16, #tpu.memory_space<vmem>>, vector<32x32xbf16>
    %20 = arith.truncf %18 : vector<32x128xf32> to vector<32x128xbf16>
    %cst_7 = arith.constant dense<0.000000e+00> : vector<32x128xf32>
    %21 = tpu.matmul %19, %20, %cst_7 {dimension_numbers = #tpu.dot_dimension_numbers<[1], [0], [0], [1], [0, 0, 1, 1], [], []>} : vector<32x32xbf16>, vector<32x128xbf16>, vector<32x128xf32> -> vector<32x128xf32>
    %c0_8 = arith.constant 0 : index
    %c0_9 = arith.constant 0 : index
    %22 = vector.load %arg5[%c0_8, %c0_9] : memref<32x1xf32, #tpu.memory_space<vmem>>, vector<32x1xf32>
    %23 = vector.broadcast %22 : vector<32x1xf32> to vector<32x128xf32>
    %24 = arith.addf %21, %23 : vector<32x128xf32>
    %25 = math.sin %24 : vector<32x128xf32>
    %c0_10 = arith.constant 0 : index
    %c0_11 = arith.constant 0 : index
    %26 = vector.load %arg6[%c0_10, %c0_11] : memref<32x32xbf16, #tpu.memory_space<vmem>>, vector<32x32xbf16>
    %27 = arith.truncf %25 : vector<32x128xf32> to vector<32x128xbf16>
    %cst_12 = arith.constant dense<0.000000e+00> : vector<32x128xf32>
    %28 = tpu.matmul %26, %27, %cst_12 {dimension_numbers = #tpu.dot_dimension_numbers<[1], [0], [0], [1], [0, 0, 1, 1], [], []>} : vector<32x32xbf16>, vector<32x128xbf16>, vector<32x128xf32> -> vector<32x128xf32>
    %c0_13 = arith.constant 0 : index
    %c0_14 = arith.constant 0 : index
    %29 = vector.load %arg7[%c0_13, %c0_14] : memref<32x1xf32, #tpu.memory_space<vmem>>, vector<32x1xf32>
    %30 = vector.broadcast %29 : vector<32x1xf32> to vector<32x128xf32>
    %31 = arith.addf %28, %30 : vector<32x128xf32>
    %32 = math.sin %31 : vector<32x128xf32>
    %c0_15 = arith.constant 0 : index
    %c0_16 = arith.constant 0 : index
    %33 = vector.load %arg8[%c0_15, %c0_16] : memref<3x32xbf16, #tpu.memory_space<vmem>>, vector<3x32xbf16>
    %34 = arith.truncf %32 : vector<32x128xf32> to vector<32x128xbf16>
    %cst_17 = arith.constant dense<0.000000e+00> : vector<3x128xf32>
    %35 = tpu.matmul %33, %34, %cst_17 {dimension_numbers = #tpu.dot_dimension_numbers<[1], [0], [0], [1], [0, 0, 1, 1], [], []>} : vector<3x32xbf16>, vector<32x128xbf16>, vector<3x128xf32> -> vector<3x128xf32>
    %c0_18 = arith.constant 0 : index
    %c0_19 = arith.constant 0 : index
    %36 = vector.load %arg9[%c0_18, %c0_19] : memref<3x1xf32, #tpu.memory_space<vmem>>, vector<3x1xf32>
    %37 = vector.broadcast %36 : vector<3x1xf32> to vector<3x128xf32>
    %38 = arith.addf %35, %37 : vector<3x128xf32>
    %cst_20 = arith.constant 1.000000e+00 : f32
    %39 = vector.broadcast %cst_20 : f32 to vector<3x128xf32>
    %40 = arith.addf %38, %39 : vector<3x128xf32>
    %cst_21 = arith.constant 5.000000e-01 : f32
    %41 = vector.broadcast %cst_21 : f32 to vector<3x128xf32>
    %42 = arith.mulf %40, %41 : vector<3x128xf32>
    %cst_22 = arith.constant 0.000000e+00 : f32
    %cst_23 = arith.constant 1.000000e+00 : f32
    %43 = vector.broadcast %cst_22 : f32 to vector<3x128xf32>
    %44 = arith.maximumf %43, %42 : vector<3x128xf32>
    %45 = vector.broadcast %cst_23 : f32 to vector<3x128xf32>
    %46 = arith.minimumf %45, %44 : vector<3x128xf32>
    %c0_24 = arith.constant 0 : index
    %c0_25 = arith.constant 0 : index
    %47 = vector.load %arg10[%c0_24, %c0_25] : memref<3x128xf32, #tpu.memory_space<vmem>>, vector<3x128xf32>
    tpu.vector_store %arg10[%c0_24, %c0_25], %46 {strides = array<i32>} : memref<3x128xf32, #tpu.memory_space<vmem>>, vector<3x128xf32>,
    return
  }
  func.func @transform_0(%arg0: i32) -> (i32, i32) {
    %c0_i32 = arith.constant 0 : i32
    %c0_i32_0 = arith.constant 0 : i32
    return %c0_i32, %arg0 : i32, i32
  }
  func.func @transform_1(%arg0: i32) -> (i32, i32) {
    %c0_i32 = arith.constant 0 : i32
    %c0_i32_0 = arith.constant 0 : i32
    %c0_i32_1 = arith.constant 0 : i32
    return %c0_i32, %c0_i32_0 : i32, i32
  }
  func.func @transform_2(%arg0: i32) -> (i32, i32) {
    %c0_i32 = arith.constant 0 : i32
    %c0_i32_0 = arith.constant 0 : i32
    %c0_i32_1 = arith.constant 0 : i32
    return %c0_i32, %c0_i32_0 : i32, i32
  }
  func.func @transform_3(%arg0: i32) -> (i32, i32) {
    %c0_i32 = arith.constant 0 : i32
    %c0_i32_0 = arith.constant 0 : i32
    %c0_i32_1 = arith.constant 0 : i32
    return %c0_i32, %c0_i32_0 : i32, i32
  }
  func.func @transform_4(%arg0: i32) -> (i32, i32) {
    %c0_i32 = arith.constant 0 : i32
    %c0_i32_0 = arith.constant 0 : i32
    %c0_i32_1 = arith.constant 0 : i32
    return %c0_i32, %c0_i32_0 : i32, i32
  }
  func.func @transform_5(%arg0: i32) -> (i32, i32) {
    %c0_i32 = arith.constant 0 : i32
    %c0_i32_0 = arith.constant 0 : i32
    %c0_i32_1 = arith.constant 0 : i32
    return %c0_i32, %c0_i32_0 : i32, i32
  }
  func.func @transform_6(%arg0: i32) -> (i32, i32) {
    %c0_i32 = arith.constant 0 : i32
    %c0_i32_0 = arith.constant 0 : i32
    %c0_i32_1 = arith.constant 0 : i32
    return %c0_i32, %c0_i32_0 : i32, i32
  }
  func.func @transform_7(%arg0: i32) -> (i32, i32) {
    %c0_i32 = arith.constant 0 : i32
    %c0_i32_0 = arith.constant 0 : i32
    %c0_i32_1 = arith.constant 0 : i32
    return %c0_i32, %c0_i32_0 : i32, i32
  }
  func.func @transform_8(%arg0: i32) -> (i32, i32) {
    %c0_i32 = arith.constant 0 : i32
    %c0_i32_0 = arith.constant 0 : i32
    %c0_i32_1 = arith.constant 0 : i32
    return %c0_i32, %c0_i32_0 : i32, i32
  }
  func.func @transform_9(%arg0: i32) -> (i32, i32) {
    %c0_i32 = arith.constant 0 : i32
    %c0_i32_0 = arith.constant 0 : i32
    return %c0_i32, %arg0 : i32, i32
  }
}

</mosaic_0001>

<bundles_post_ra>
// kernel: siren_net_forward.1
= control target key start
LH: loop header
LB: loop body
LE: loop exit
PB: predicated region body
PF: predicated region fallthrough
CT: control target
= control target key end

     0   :  { %14 = vsyncpa [#allocation3], 0  ;;  %s4449_s0 = inlined_call_operand.vmem [shape: f32[2,256], index: 0, kind: input, shape index: {}]   ;;  %s4450_s1 = inlined_call_operand.vmem [shape: f32[32,2], index: 1, kind: input, shape index: {}]   ;;  %s4451_s2 = inlined_call_operand.vmem [shape: f32[32,1], index: 2, kind: input, shape index: {}]   ;;  %s4452_s3 = inlined_call_operand.vmem [shape: bf16[32,32], index: 3, kind: input, shape index: {}]   ;;  %s4453_s4 = inlined_call_operand.vmem [shape: f32[32,1], index: 4, kind: input, shape index: {}]   ;;  %s4454_s5 = inlined_call_operand.vmem [shape: bf16[32,32], index: 5, kind: input, shape index: {}]   ;;  %s4455_s6 = inlined_call_operand.vmem [shape: f32[32,1], index: 6, kind: input, shape index: {}]   ;;  %s4456_s7 = inlined_call_operand.vmem [shape: bf16[3,32], index: 7, kind: input, shape index: {}]   ;;  %s4457_s8 = inlined_call_operand.vmem [shape: f32[3,1], index: 8, kind: input, shape index: {}]   ;;  %s4458_s9 = inlined_call_operand.hbm [shape: f32[3,256], index: 9, kind: output, shape index: {}]  }
   0x1   :  { %16 = vsyncpa [#allocation3 + $0x1], 0  ;;  %s2759_s30 = smov 0   ;;  %s2761_s10 = smov 0  }
   0x2   :  { %s2763_s11 = smov 0   ;;  %s2765_s12 = smov 0  }
   0x3 LB: > { %s2780_s13 = sadd.s32 4294967295, %s2699_s12   ;;  %s2512_s14 = sadd.s32 4294967294, %s2699_s12   ;;  %s2699_s12 = sphi %s2765_s12, %s4558_s12   ;;  %s2695_s11 = sphi %s2763_s11, %s4557_s11   ;;  %s2691_s10 = sphi %s2761_s10, %s4556_s10   ;;  %s2687_s30 = sphi %s2759_s30, %s4555_s30  }
   0x4   : > { %s2784_s15 = sadd.s32 1, %s2699_s12   ;;  %s223_s16 = sadd.s32 1, %s2695_s11 }
   0x5   : > { %s220_s17 = ssub.s32 %s2699_s12, %s2784_s15  ;;  %p233_p0 = scmp.ne.s32.totalorder %s2695_s11, %s2691_s10 }
   0x6   : > { %p221_p1 = scmp.eq.s32.totalorder %s220_s17, 0  ;;  %p234_p2 = scmp.eq.s32.totalorder %s2780_s13, 1 }
   0x7   : > { %p239_p3 = scmp.ne.s32.totalorder %s2691_s10, %s2687_s30  ;;  %p240_p4 = scmp.eq.s32.totalorder %s2512_s14, 1 }
   0x8   : > { %s2795_s18 = scalar_select %p221_p1, %s2695_s11, %s223_s16  }
   0x9   : > { %p2797_p5 = por %p234_p2, %p233_p0  ;;  %p2801_p6 = por %p240_p4, %p239_p3 }
   0xa   : > { %p2515_p7 = scmp.ge.s32.totalorder %s2699_s12, 1  ;;  %p289_p8 = scmp.lt.s32.totalorder %s2699_s12, 3 }
   0xc   : > { %p290_p9 = pnand %p2515_p7, %p289_p8 }
   0xd   : > { %p324_p10 = scmp.lt.s32.totalorder (!%p290_p9), %s2780_s13, 1  ;;  %s321_s22 = sand.u32 (!%p290_p9), 1, %s2691_s10  }
   0xe   : > { %293 = sbr.rel (%p290_p9) target bundleno = 1111 (0x457), region = 56  ;;  %s2576_s24 = sshll.u32 (!%p290_p9), %s2780_s13, 2 }
   0xf   : > { %s2448_s27 = scalar_lea.hbm (!%p290_p9), %s4458_s9, %s2576_s24 }
  0x10   : > { %s2452_s14 = sshll.u32 (!%p290_p9), %s2448_s27, 4  ;;  %s2453_s14 = int_to_ptr.hbm [resolvable:$true] %s2452_s14 }
  0x13   : > { %v332_v0 = vld [vmem:[%s4450_s1 + $0x10] sm:$0xff]  ;;  %v330_v1 = vld [vmem:[%s4450_s1] sm:$0xff]  ;;  %v2701_v2 = vmov 1   ;;  %v4480_v3 = vmov 0   ;;  %v333_v4 = vld [vmem:[%s4450_s1 + $0x18] sm:$0xff]  ;;  %s325_s16 = scalar_select %p324_p10, %s2780_s13, 1 }
  0x14   : > { %2634 = vset.pattern.permute.xlu0 %v2701_v2  ;;  %2632 = vset.pattern.permute.xlu1 %v2701_v2  ;;  %v331_v5 = vld [vmem:[%s4450_s1 + $0x8] sm:$0xff]  ;;  %v386_v6 = vld [vmem:[%s4451_s2 + $0x10] sm:$0xff]  ;;  %v384_v7 = vld [vmem:[%s4451_s2] sm:$0xff] }
  0x15   : > { %2633 = vset.pattern.permute.xlu2 %v4480_v3  ;;  %368 = vperm.xlu1 %2632, %v332_v0   ;;  %v387_v8 = vld [vmem:[%s4451_s2 + $0x18] sm:$0xff]  ;;  %v385_v9 = vld [vmem:[%s4451_s2 + $0x8] sm:$0xff]  ;;  %v1044_v11 = vld [vmem:[%s4453_s4 + $0x10] sm:$0xff]  ;;  %s2517_s17 = sshll.u32 %s325_s16, 1  ;;  %s2438_s16 = scalar_lea.sflag [#allocation3], %s321_s22 }
  0x16   : > { %360 = vperm.xlu0 %2634, %v330_v1   ;;  %336 = vperm.xlu2 %2633, %v330_v1   ;;  %v1045_v10 = vld [vmem:[%s4453_s4 + $0x18] sm:$0xff]  ;;  %v1730_v12 = vld [vmem:[%s4455_s6 + $0x10] sm:$0xff]  ;;  %v1043_v13 = vld [vmem:[%s4453_s4 + $0x8] sm:$0xff]  ;;  %s327_s23 = scalar_lea.vmem %s4449_s0, %s2517_s17  ;;  %s2651_s17 = sshra.s32 %s2453_s14, 4  ;;  %s2652_s17 = int_to_ptr.hbm [resolvable:$true] %s2651_s17 }
  0x17   : > { %v1042_v14 = vld [vmem:[%s4453_s4] sm:$0xff]  ;;  %v1729_v15 = vld [vmem:[%s4455_s6 + $0x8] sm:$0xff]  ;;  %v1731_v17 = vld [vmem:[%s4455_s6 + $0x18] sm:$0xff]  ;;  %s2653_s13 = scalar_lea.hbm %s2652_s17, 4  ;;  %p2658_p0 = scmp.lt.s32.totalorder %s2652_s17, %s4458_s9 }
  0x18   : > { %v1728_v16 = vld [vmem:[%s4455_s6] sm:$0xff]  ;;  %p2654_p11 = scmp.ne.s32.totalorder %s2652_s17, %s2653_s13 }
  0x19   : > { %v2410_v18 = vld [vmem:[%s4457_s8] sm:$0x7] }
  0x1a   : > { %v329_v21 = vld [vmem:[%s327_s23] sm:$0x3]  ;;  %s2516_s23 = sshll.u32 %s321_s22, 2  ;;  %p2655_p12 = pnand %p2654_p11, %p2797_p5 }
  0x1b   : > { %v354_v23 = vperm.slane %v329_v21, 0  ;;  %v375_v24 = vperm.slane %v329_v21, 1  ;;  %s323_s28 = scalar_lea.vmem [#allocation2], %s2516_s23  ;;  %s2657_s23 = scalar_lea.hbm %s4458_s9, 8 }
  0x1c   : > { %s2450_s29 = sshll.u32 %s323_s28, 4  ;;  %p2656_p13 = pneg %p2655_p12  ;;  %s2451_s29 = int_to_ptr.vmem [resolvable:$true] %s2450_s29 }
  0x1d   : > { %372 = vperm.xlu1 %2632, %v333_v4   ;;  %p2659_p1 = scmp.lt.s32.totalorder %s2657_s23, %s2653_s13 }
  0x1e   : > { %2635 = vset.pattern.permute.xlu0 %v4480_v3  ;;  %341 = vperm.xlu2 %2633, %v331_v5  }
  0x1f   : > { %346 = vperm.xlu0 %2635, %v332_v0   ;;  %p2660_p2 = por %p2659_p1, %p2658_p0 }
  0x21   : > { %p2661_p3 = pnand %p2660_p2, %p2656_p13 }
  0x25   : > { %364 = vperm.xlu1 %2632, %v331_v5  }
  0x26   : > { %400 = vperm.xlu2 %2633, %v386_v6  }
  0x27   : > { %351 = vperm.xlu0 %2635, %v333_v4   ;;  %v4465_v4 = vmov 920167782  }
  0x2d   : > { %2636 = vset.pattern.permute.xlu1 %v4480_v3 }
  0x2e   : > { %390 = vperm.xlu2 %2633, %v384_v7   ;;  %405 = vperm.xlu1 %2636, %v387_v8  }
  0x2f   : > { %395 = vperm.xlu0 %2635, %v385_v9  }
  0x36   : > { %1063 = vperm.xlu2 %2633, %v1045_v10   ;;  %1058 = vperm.xlu1 %2636, %v1044_v11   ;;  %v4467_v10 = vmov 2102212464  }
  0x37   : > { %1744 = vperm.xlu0 %2635, %v1730_v12   ;;  %v4463_v12 = vmov 1326507024  }
  0x3e   : > { %1053 = vperm.xlu2 %2633, %v1043_v13   ;;  %1048 = vperm.xlu1 %2636, %v1042_v14  }
  0x3f   : > { %1739 = vperm.xlu0 %2635, %v1729_v15  }
  0x46   : > { %1734 = vperm.xlu2 %2633, %v1728_v16   ;;  %1749 = vperm.xlu1 %2636, %v1731_v17  }
  0x4e   : > { %2413 = vperm.xlu1 %2636, %v2410_v18   ;;  %v4477_v18 = vmov 683565275  }
  0x70   : > { %v337_v19 = vpop.permute.xlu2 %336 }
  0x71   : > { %v355_v25 = vmul.f32 %v354_v23, %v337_v19 }
  0x78   : > { %v342_v20 = vpop.permute.xlu2 %341 }
  0x79   : > { %v356_v44 = vmul.f32 %v354_v23, %v342_v20  ;;  %v4475_v20 = vmov 2475754826  }
  0x80   : > { %v401_v22 = vpop.permute.xlu2 %400 }
  0x87   : > { %v369_v26 = vpop.permute.xlu1 %368 }
  0x88   : > { %v361_v27 = vpop.permute.xlu0 %360  ;;  %v391_v30 = vpop.permute.xlu2 %390  ;;  %v378_v36 = vmul.f32 %v375_v24, %v369_v26 }
  0x89   : > { %v376_v28 = vmul.f32 %v375_v24, %v361_v27 }
  0x8b   : > { %v380_v29 = vadd.f32 %v376_v28, %v355_v25 }
  0x8d   : > { %v408_v31 = vadd.f32 %v391_v30, %v380_v29 }
  0x8f   : > { %v2866_v32 = vmul.f32 30.0, %v408_v31  ;;  %v373_v33 = vpop.permute.xlu1 %372 }
  0x90   : > { %v379_v53 = vmul.f32 %v375_v24, %v373_v33 }
  0x91   : > { %v419_v34 = vand.u32 2139095040, %v2866_v32  ;;  %v347_v35 = vpop.permute.xlu0 %346  ;;  %v4460_v55 = vand.u32 2147483647, %v2866_v32 }
  0x92   : > { %v357_v37 = vmul.f32 %v354_v23, %v347_v35 }
  0x93   : > { %v420_v38 = vshrl.u32 %v419_v34, 23  ;;  %v423_v0 = vand.u32 8388607, %v4460_v55 }
  0x94   : > { %v382_v39 = vadd.f32 %v378_v36, %v357_v37 }
  0x95   : > { %v2518_v40 = vadd.s32 4294967169, %v420_v38  ;;  %v424_v8 = vor.u32 8388608, %v423_v0 }
  0x96   : > { %v410_v41 = vadd.f32 %v401_v22, %v382_v39 }
  0x97   : > { %v426_v42 = vadd.s32 1, %v2518_v40  ;;  %v365_v43 = vpop.permute.xlu1 %364  ;;  %v2908_v39 = vshll.u32 %v424_v8, 8 }
  0x98   : > { %v2869_v45 = vmul.f32 30.0, %v410_v41  ;;  %v377_v46 = vmul.f32 %v375_v24, %v365_v43  ;;  %v4469_v24 = vmov 2131351028  }
  0x99   : > { %vm427_vm0 = vcmp.gt.s32.totalorder %v426_v42, 0  ;;  %v352_v47 = vpop.permute.xlu0 %351 }
  0x9a   : > { %v729_v48 = vand.u32 2139095040, %v2869_v45  ;;  %v381_v49 = vadd.f32 %v377_v46, %v356_v44  ;;  %v428_v50 = vsel %vm427_vm0, %v426_v42, 0  ;;  %v358_v52 = vmul.f32 %v354_v23, %v352_v47 }
  0x9b   : > { %v430_v54 = vand.u32 31, %v428_v50  ;;  %v2885_v9 = vshrl.u32 %v428_v50, 5  ;;  %v4462_v23 = vand.u32 2147483647, %v2869_v45 }
  0x9c   : > { %v730_v51 = vshrl.u32 %v729_v48, 23  ;;  %v383_v58 = vadd.f32 %v379_v53, %v358_v52  ;;  %v2930_v52 = vshrl.u32 %v2908_v39, 16 }
  0x9d   : > { %v2873_v63 = vsub.s32 32, %v430_v54  ;;  %v442_v11 = vshll.u32 %v4467_v10, %v430_v54  ;;  %v433_v19 = vshll.u32 %v4477_v18, %v430_v54  ;;  %v445_v22 = vshll.u32 %v4465_v4, %v430_v54 }
  0x9e   : > { %v2524_v56 = vadd.s32 4294967169, %v730_v51  ;;  %v436_v29 = vshll.u32 %v4475_v20, %v430_v54  ;;  %v439_v30 = vshll.u32 %v4469_v24, %v430_v54  ;;  %vm451_vm2 = vcmp.lt.s32.totalorder %v2885_v9, 4 }
  0x9f   : > { %v443_v5 = vshrl.u32 %v4465_v4, %v2873_v63  ;;  %v446_v13 = vshrl.u32 %v4463_v12, %v2873_v63  ;;  %v434_v21 = vshrl.u32 %v4475_v20, %v2873_v63  ;;  %v437_v25 = vshrl.u32 %v4469_v24, %v2873_v63 }
  0xa0   : > { %v406_v57 = vpop.permute.xlu1 %405  ;;  %v736_v60 = vadd.s32 1, %v2524_v56  ;;  %v440_v26 = vshrl.u32 %v4467_v10, %v2873_v63  ;;  %v2918_v47 = vand.u32 8388607, %v4462_v23  ;;  %vm448_vm4 = vcmp.lt.s32.totalorder %v2885_v9, 1 }
  0xa1   : > { %v396_v59 = vpop.permute.xlu0 %395  ;;  %v411_v61 = vadd.f32 %v406_v57, %v383_v58  ;;  %v444_v27 = vor.u32 %v443_v5, %v442_v11  ;;  %v447_v34 = vor.u32 %v446_v13, %v445_v22  ;;  %v2905_v38 = vor.u32 %v434_v21, %v433_v19 }
  0xa2   : > { %v409_v62 = vadd.f32 %v396_v59, %v381_v49  ;;  %vm737_vm1 = vcmp.gt.s32.totalorder %v736_v60, 0  ;;  %v2910_v40 = vor.u32 %v437_v25, %v436_v29  ;;  %v2912_v41 = vor.u32 %v440_v26, %v439_v30 }
  0xa3   : > { %v2877_v1 = vmul.f32 30.0, %v411_v61  ;;  %v738_v14 = vsel %vm737_vm1, %v736_v60, 0  ;;  %v457_v42 = vsel %vm451_vm2, %v444_v27, 920167782  ;;  %v461_v48 = vsel %vm451_vm2, %v447_v34, 1326507024 }
  0xa4   : > { %v2879_v2 = vmul.f32 30.0, %v409_v62  ;;  %v740_v31 = vand.u32 31, %v738_v14  ;;  %vm450_vm5 = vcmp.lt.s32.totalorder %v2885_v9, 3  ;;  %v2927_v51 = vand.u32 65535, %v2908_v39 }
  0xa5   : > { %v884_v6 = vand.u32 2139095040, %v2877_v1  ;;  %v4461_v15 = vand.u32 2147483647, %v2877_v1  ;;  %v2936_v53 = vsel %vm448_vm4, %v2905_v38, %v2910_v40  ;;  %v2941_v54 = vsel %vm450_vm5, %v2912_v41, %v457_v42 }
  0xa6   : > { %v574_v7 = vand.u32 2139095040, %v2879_v2  ;;  %v4459_v37 = vand.u32 2147483647, %v2879_v2  ;;  %v741_v43 = vsub.s32 32, %v740_v31  ;;  %v2947_v56 = vsel %vm448_vm4, %v2910_v40, %v2912_v41 }
  0xa7   : > { %v885_v16 = vshrl.u32 %v884_v6, 23  ;;  %v888_v35 = vand.u32 8388607, %v4461_v15  ;;  %v2951_v58 = vsel %vm450_vm5, %v444_v27, %v461_v48  ;;  %v734_v0 = vor.u32 8388608, %v2918_v47 }
  0xa8   : > { %v575_v17 = vshrl.u32 %v574_v7, 23  ;;  %v578_v50 = vand.u32 8388607, %v4459_v37  ;;  %v744_v59 = vshrl.u32 %v4475_v20, %v741_v43  ;;  %v747_v60 = vshrl.u32 %v4469_v24, %v741_v43 }
  0xa9   : > { %v2527_v28 = vadd.s32 4294967169, %v885_v16  ;;  %v889_v49 = vor.u32 8388608, %v888_v35  ;;  %v750_v5 = vshrl.u32 %v4467_v10, %v741_v43  ;;  %v2959_v6 = vshrl.u32 %v738_v14, 5 }
  0xaa   : > { %v2521_v33 = vadd.s32 4294967169, %v575_v17  ;;  %v579_v62 = vor.u32 8388608, %v578_v50  ;;  %v743_v7 = vshll.u32 %v4477_v18, %v740_v31  ;;  %v746_v8 = vshll.u32 %v4475_v20, %v740_v31 }
  0xab   : > { %v891_v36 = vadd.s32 1, %v2527_v28  ;;  %v2955_v61 = vshll.u32 %v889_v49, 8  ;;  %v753_v11 = vshrl.u32 %v4465_v4, %v741_v43  ;;  %v749_v17 = vshll.u32 %v4469_v24, %v740_v31 }
  0xac   : > { %v581_v46 = vadd.s32 1, %v2521_v33  ;;  %v756_v19 = vshrl.u32 %v4463_v12, %v741_v43  ;;  %v742_v21 = vshrl.u32 %v4477_v18, %v741_v43  ;;  %v745_v22 = vor.u32 %v744_v59, %v743_v7 }
  0xad   : > { %vm892_vm3 = vcmp.gt.s32.totalorder %v891_v36, 0  ;;  %v2969_v25 = vor.u32 %v747_v60, %v746_v8  ;;  %v752_v14 = vshll.u32 %v4467_v10, %v740_v31  ;;  %v2973_v26 = vand.u32 65535, %v2955_v61 }
  0xae   : > { %v893_v44 = vsel %vm892_vm3, %v891_v36, 0  ;;  %vm582_vm6 = vcmp.gt.s32.totalorder %v581_v46, 0  ;;  %v2975_v27 = vshll.u32 %v579_v62, 8  ;;  %v751_v28 = vor.u32 %v750_v5, %v749_v17 }
  0xaf   : > { %v895_v57 = vand.u32 31, %v893_v44  ;;  %v583_v16 = vsel %vm582_vm6, %v581_v46, 0  ;;  %v755_v29 = vshll.u32 %v4465_v4, %v740_v31  ;;  %v2978_v30 = vshrl.u32 %v893_v44, 5 }
  0xb0   : > { %v2981_v33 = vshrl.u32 %v2955_v61, 16  ;;  %v2983_v34 = vshrl.u32 %v583_v16, 5  ;;  %v754_v35 = vor.u32 %v753_v11, %v752_v14  ;;  %v2987_v42 = vand.u32 31, %v583_v16 }
  0xb1   : > { %v2964_v13 = vsub.s32 32, %v895_v57  ;;  %v757_v43 = vor.u32 %v756_v19, %v755_v29  ;;  %vm758_vm7 = vcmp.lt.s32.totalorder %v2959_v6, 1  ;;  %vm759_vm8 = vcmp.lt.s32.totalorder %v2959_v6, 2 }
  0xb2   : > { %vm760_vm9 = vcmp.lt.s32.totalorder %v2959_v6, 3  ;;  %v898_v44 = vshll.u32 %v4477_v18, %v895_v57  ;;  %v907_v49 = vshll.u32 %v4467_v10, %v895_v57  ;;  %v901_v50 = vshll.u32 %v4475_v20, %v895_v57 }
  0xb3   : > { %v908_v36 = vshrl.u32 %v4465_v4, %v2964_v13  ;;  %v899_v46 = vshrl.u32 %v4475_v20, %v2964_v13  ;;  %v911_v31 = vshrl.u32 %v4463_v12, %v2964_v13  ;;  %v902_v47 = vshrl.u32 %v4469_v24, %v2964_v13 }
  0xb4   : > { %v905_v48 = vshrl.u32 %v4467_v10, %v2964_v13  ;;  %v910_v59 = vshll.u32 %v4465_v4, %v895_v57  ;;  %vm761_vm10 = vcmp.lt.s32.totalorder %v2959_v6, 4  ;;  %v766_v60 = vsel %vm758_vm7, %v745_v22, %v2969_v25 }
  0xb5   : > { %v904_v62 = vshll.u32 %v4469_v24, %v895_v57  ;;  %v909_v5 = vor.u32 %v908_v36, %v907_v49  ;;  %vm913_vm11 = vcmp.lt.s32.totalorder %v2978_v30, 1  ;;  %v767_v7 = vsel %vm761_vm10, %v754_v35, 920167782 }
  0xb6   : > { %v3012_v8 = vor.u32 %v899_v46, %v898_v44  ;;  %v912_v11 = vor.u32 %v911_v31, %v910_v59  ;;  %vm916_vm12 = vcmp.lt.s32.totalorder %v2978_v30, 4  ;;  %v768_v16 = vsel %vm760_vm9, %v751_v28, %v767_v7 }
  0xb7   : > { %v3017_v17 = vor.u32 %v902_v47, %v901_v50  ;;  %v3019_v19 = vor.u32 %v905_v48, %v904_v62  ;;  %v769_v57 = vsel %vm759_vm8, %v766_v60, %v768_v16  ;;  %v770_v14 = vsel %vm758_vm7, %v2969_v25, %v751_v28 }
  0xb8   : > { %v771_v29 = vsel %vm761_vm10, %v757_v43, 1326507024  ;;  %v3028_v36 = vshll.u32 %v734_v0, 8  ;;  %v799_v46 = vand.u32 65535, %v769_v57  ;;  %v800_v31 = vshrl.u32 %v769_v57, 16 }
  0xb9   : > { %vm915_vm13 = vcmp.lt.s32.totalorder %v2978_v30, 3  ;;  %v922_v44 = vsel %vm916_vm12, %v909_v5, 920167782  ;;  %v3034_v47 = vsub.s32 32, %v2987_v42  ;;  %v772_v48 = vsel %vm760_vm9, %v754_v35, %v771_v29 }
  0xba   : > { %v926_v49 = vsel %vm916_vm12, %v912_v11, 1326507024  ;;  %v773_v0 = vsel %vm759_vm8, %v770_v14, %v772_v48  ;;  %v775_v43 = vand.u32 65535, %v3028_v36  ;;  %v776_v50 = vshrl.u32 %v3028_v36, 16 }
  0xbb   : > { %v921_v59 = vsel %vm913_vm11, %v3012_v8, %v3017_v17  ;;  %v763_v60 = vsel %vm761_vm10, %v751_v28, 2102212464  ;;  %v777_v62 = vand.u32 65535, %v773_v0  ;;  %v778_v35 = vshrl.u32 %v773_v0, 16 }
  0xbc   : > { %v923_v7 = vsel %vm915_vm13, %v3019_v19, %v922_v44  ;;  %v925_v11 = vsel %vm913_vm11, %v3017_v17, %v3019_v19  ;;  %v802_v16 = vmul.u32 %v800_v31, %v775_v43  ;;  %v803_v57 = vmul.u32 %v799_v46, %v776_v50 }
  0xbd   : > { %v927_v14 = vsel %vm915_vm13, %v909_v5, %v926_v49  ;;  %v762_v29 = vsel %vm758_vm7, %v742_v21, %v745_v22  ;;  %v780_v28 = vmul.u32 %v778_v35, %v775_v43  ;;  %v781_v48 = vmul.u32 %v777_v62, %v776_v50 }
  0xbe   : > { %v764_v0 = vsel %vm760_vm9, %v2969_v25, %v763_v60  ;;  %v801_v44 = vmul.u32 %v799_v46, %v775_v43  ;;  %v805_v37 = vshll.u32 %v802_v16, 16  ;;  %vm914_vm14 = vcmp.lt.s32.totalorder %v2978_v30, 2 }
  0xbf   : > { %v779_v55 = vmul.u32 %v777_v62, %v775_v43  ;;  %v782_v15 = vmul.u32 %v778_v35, %v776_v50  ;;  %v783_v23 = vshll.u32 %v780_v28, 16  ;;  %v804_v12 = vmul.u32 %v800_v31, %v776_v50 }
  0xc0   : > { %v806_v4 = vshrl.u32 %v802_v16, 16  ;;  %v807_v10 = vshll.u32 %v803_v57, 16  ;;  %vm809_vm15 = vc.u32 %v801_v44, %v805_v37  ;;  %v811_v5 = vadd.s32 %v805_v37, %v801_v44 }
  0xc1   : > { %v785_v49 = vshll.u32 %v781_v48, 16  ;;  %vm787_vm0 = vc.u32 %v779_v55, %v783_v23  ;;  %v789_v21 = vadd.s32 %v783_v23, %v779_v55  ;;  %v810_v22 = vsel %vm809_vm15, 1, %v4480_v3 }
  0xc2   : > { %v788_v24 = vsel %vm787_vm0, 1, %v4480_v3  ;;  %v812_v25 = vadd.s32 %v810_v22, %v804_v12  ;;  %vm813_vm1 = vc.u32 %v811_v5, %v807_v10  ;;  %v924_v46 = vsel %vm914_vm14, %v921_v59, %v923_v7 }
  0xc3   : > { %v790_v43 = vadd.s32 %v788_v24, %v782_v15  ;;  %vm791_vm3 = vc.u32 %v789_v21, %v785_v49  ;;  %v814_v31 = vsel %vm813_vm1, 1, %v4480_v3  ;;  %v928_v50 = vsel %vm914_vm14, %v925_v11, %v927_v14 }
  0xc4   : > { %v792_v37 = vsel %vm791_vm3, 1, %v4480_v3  ;;  %v816_v60 = vadd.s32 %v814_v31, %v812_v25  ;;  %v932_v55 = vand.u32 65535, %v928_v50  ;;  %v933_v23 = vshrl.u32 %v928_v50, 16 }
  0xc5   : > { %v784_v62 = vshrl.u32 %v780_v28, 16  ;;  %v794_v35 = vadd.s32 %v792_v37, %v790_v43  ;;  %v954_v16 = vand.u32 65535, %v924_v46  ;;  %v955_v12 = vshrl.u32 %v924_v46, 16 }
  0xc6   : > { %v808_v44 = vshrl.u32 %v803_v57, 16  ;;  %v817_v22 = vadd.s32 %v816_v60, %v806_v4  ;;  %v935_v59 = vmul.u32 %v933_v23, %v2973_v26  ;;  %v936_v15 = vmul.u32 %v932_v55, %v2981_v33 }
  0xc7   : > { %v765_v24 = vsel %vm759_vm8, %v762_v29, %v764_v0  ;;  %v786_v7 = vshrl.u32 %v781_v48, 16  ;;  %v795_v11 = vadd.s32 %v794_v35, %v784_v62  ;;  %v957_v14 = vmul.u32 %v955_v12, %v2973_v26 }
  0xc8   : > { %v3078_v49 = vadd.s32 %v811_v5, %v807_v10  ;;  %v818_v21 = vadd.s32 %v817_v22, %v808_v44  ;;  %v934_v28 = vmul.u32 %v932_v55, %v2973_v26  ;;  %v938_v25 = vshll.u32 %v935_v59, 16 }
  0xc9   : > { %v3081_v46 = vadd.s32 %v795_v11, %v786_v7  ;;  %v937_v4 = vmul.u32 %v933_v23, %v2981_v33  ;;  %v940_v57 = vshll.u32 %v936_v15, 16  ;;  %v958_v43 = vmul.u32 %v954_v16, %v2981_v33 }
  0xca   : > { %v822_v31 = vadd.s32 1, %v818_v21  ;;  %vm942_vm6 = vc.u32 %v934_v28, %v938_v25  ;;  %v944_v6 = vadd.s32 %v938_v25, %v934_v28  ;;  %v960_v29 = vshll.u32 %v957_v14, 16 }
  0xcb   : > { %v819_v48 = vmul.u32 %v3028_v36, %v765_v24  ;;  %vm821_vm7 = vc.u32 %v3081_v46, %v3078_v49  ;;  %v943_v10 = vsel %vm942_vm6, 1, %v4480_v3  ;;  %v956_v0 = vmul.u32 %v954_v16, %v2973_v26 }
  0xcc   : > { %v823_v5 = vsel %vm821_vm7, %v822_v31, %v818_v21  ;;  %v939_v50 = vshrl.u32 %v935_v59, 16  ;;  %v945_v37 = vadd.s32 %v943_v10, %v937_v4  ;;  %vm946_vm8 = vc.u32 %v944_v6, %v940_v57 }
  0xcd   : > { %v824_v60 = vadd.s32 %v823_v5, %v819_v48  ;;  %v947_v55 = vsel %vm946_vm8, 1, %v4480_v3  ;;  %v959_v23 = vmul.u32 %v955_v12, %v2981_v33  ;;  %vm964_vm9 = vc.u32 %v956_v0, %v960_v29 }
  0xce   : > { %v949_v62 = vadd.s32 %v947_v55, %v945_v37  ;;  %v962_v35 = vshll.u32 %v958_v43, 16  ;;  %v965_v36 = vsel %vm964_vm9, 1, %v4480_v3  ;;  %v966_v44 = vadd.s32 %v960_v29, %v956_v0 }
  0xcf   : > { %v3095_v22 = vshll.u32 %v4477_v18, %v2987_v42  ;;  %v3099_v26 = vshrl.u32 %v4475_v20, %v3034_v47  ;;  %v825_v16 = vadd.s32 536870912, %v824_v60  ;;  %v967_v59 = vadd.s32 %v965_v36, %v959_v23 }
  0xd0   : > { %v918_v33 = vsel %vm916_vm12, %v3019_v19, 2102212464  ;;  %v941_v12 = vshrl.u32 %v936_v15, 16  ;;  %v950_v24 = vadd.s32 %v949_v62, %v939_v50  ;;  %vm968_vm10 = vc.u32 %v966_v44, %v962_v35 }
  0xd1   : > { %v4492_v7 = vmov 2131351028   ;;  %v3106_v21 = vshrl.u32 %v825_v16, 30  ;;  %v897_v28 = vshrl.u32 %v4477_v18, %v2964_v13  ;;  %v969_v25 = vsel %vm968_vm10, 1, %v4480_v3 }
  0xd2   : > { %v592_v11 = vshrl.u32 %v4492_v7, %v3034_v47  ;;  %v3111_v4 = vadd.s32 %v950_v24, %v941_v12  ;;  %v961_v57 = vshrl.u32 %v957_v14, 16  ;;  %v971_v31 = vadd.s32 %v969_v25, %v967_v59 }
  0xd3   : > { %vm449_vm15 = vcmp.lt.s32.totalorder %v2885_v9, 2  ;;  %v827_v19 = vshll.u32 %v3106_v21, 30  ;;  %v917_v15 = vsel %vm913_vm11, %v897_v28, %v3012_v8  ;;  %v919_v6 = vsel %vm915_vm13, %v3017_v17, %v918_v33 }
  0xd4   : > { %v463_v13 = vsel %vm449_vm15, %v2947_v56, %v2951_v58  ;;  %v963_v29 = vshrl.u32 %v958_v43, 16  ;;  %v3125_v14 = vadd.s32 %v966_v44, %v962_v35  ;;  %v972_v48 = vadd.s32 %v971_v31, %v961_v57 }
  0xd5   : > { %v467_v10 = vand.u32 65535, %v463_v13  ;;  %v591_v0 = vshll.u32 %v4475_v20, %v2987_v42  ;;  %v594_v8 = vshll.u32 %v4492_v7, %v2987_v42  ;;  %v828_v5 = vsub.s32 %v824_v60, %v827_v19 }
  0xd6   : > { %v468_v50 = vshrl.u32 %v463_v13, 16  ;;  %v920_v17 = vsel %vm914_vm14, %v917_v15, %v919_v6  ;;  %v973_v37 = vadd.s32 %v972_v48, %v963_v29  ;;  %vm976_vm11 = vc.u32 %v3111_v4, %v3125_v14 }
  0xd7   : > { %v459_v56 = vsel %vm449_vm15, %v2936_v53, %v2941_v54  ;;  %vm829_vm12 = vcmp.lt.s32.totalorder %v828_v5, 0  ;;  %v830_v58 = vsub.s32 0, %v828_v5  ;;  %v3143_v60 = vmul.u32 %v467_v10, %v2930_v52 }
  0xd8   : > { %v3140_v43 = vmul.u32 %v468_v50, %v2927_v51  ;;  %v3145_v55 = vor.u32 %v592_v11, %v591_v0  ;;  %v4493_v30 = vmov 2102212464   ;;  %v977_v35 = vadd.s32 1, %v973_v37 }
  0xd9   : > { %v595_v23 = vshrl.u32 %v4493_v30, %v3034_v47  ;;  %v3151_v62 = vshll.u32 %v4493_v30, %v2987_v42  ;;  %v4494_v53 = vmov 920167782   ;;  %v831_v36 = vsel %vm829_vm12, %v830_v58, %v828_v5 }
  0xda   : > { %v3155_v54 = vshrl.u32 %v4494_v53, %v3034_v47  ;;  %v974_v44 = vmul.u32 %v2955_v61, %v920_v17  ;;  %v473_v16 = vshll.u32 %v3140_v43, 16  ;;  %v832_v59 = vclz %v831_v36 }
  0xdb   : > { %v978_v33 = vsel %vm976_vm11, %v977_v35, %v973_v37  ;;  %v469_v12 = vmul.u32 %v467_v10, %v2927_v51  ;;  %v490_v24 = vshrl.u32 %v459_v56, 16  ;;  %v472_v28 = vmul.u32 %v468_v50, %v2930_v52 }
  0xdc   : > { %v979_v11 = vadd.s32 %v978_v33, %v974_v44  ;;  %v475_v25 = vshll.u32 %v3143_v60, 16  ;;  %v489_v57 = vand.u32 65535, %v459_v56  ;;  %v2525_v31 = vadd.s32 4294967294, %v832_v59 }
  0xdd   : > { %vm477_vm13 = vc.u32 %v469_v12, %v473_v16  ;;  %v479_v19 = vadd.s32 %v473_v16, %v469_v12  ;;  %v492_v15 = vmul.u32 %v490_v24, %v2927_v51  ;;  %v600_v61 = vshll.u32 %v4494_v53, %v2987_v42 }
  0xde   : > { %v4495_v6 = vmov 1326507024   ;;  %v980_v29 = vadd.s32 536870912, %v979_v11  ;;  %v478_v48 = vsel %vm477_vm13, 1, %v4480_v3  ;;  %vm2526_vm14 = vcmp.lt.s32.totalorder %v2525_v31, 0 }
  0xdf   : > { %v601_v13 = vshrl.u32 %v4495_v6, %v3034_v47  ;;  %v480_v10 = vadd.s32 %v478_v48, %v472_v28  ;;  %vm481_vm0 = vc.u32 %v479_v19, %v475_v25  ;;  %v495_v0 = vshll.u32 %v492_v15, 16 }
  0xe0   : > { %v820_v50 = vadd.s32 %v3078_v49, %v3081_v46  ;;  %v835_v17 = vsel %vm2526_vm14, 0, %v2525_v31  ;;  %v3170_v37 = vshrl.u32 %v980_v29, 30  ;;  %v482_v56 = vsel %vm481_vm0, 1, %v4480_v3 }
  0xe1   : > { %v836_v58 = vsub.s32 32, %v835_v17  ;;  %v840_v42 = vsub.s32 4294967266, %v835_v17  ;;  %v491_v35 = vmul.u32 %v489_v57, %v2927_v51  ;;  %v493_v36 = vmul.u32 %v489_v57, %v2930_v52 }
  0xe2   : > { %v3175_v44 = vor.u32 %v595_v23, %v594_v8  ;;  %v602_v16 = vor.u32 %v601_v13, %v600_v61  ;;  %v837_v59 = vshll.u32 %v828_v5, %v835_v17  ;;  %v982_v33 = vshll.u32 %v3170_v37, 30 }
  0xe3   : > { %v838_v12 = vshrl.u32 %v820_v50, %v836_v58  ;;  %v841_v28 = vadd.s32 127, %v840_v42  ;;  %v484_v49 = vadd.s32 %v482_v56, %v480_v10  ;;  %vm499_vm1 = vc.u32 %v491_v35, %v495_v0 }
  0xe4   : > { %v3178_v46 = vsub.s32 %v979_v11, %v982_v33  ;;  %v494_v25 = vmul.u32 %v490_v24, %v2930_v52  ;;  %v500_v31 = vsel %vm499_vm1, 1, %v4480_v3  ;;  %v501_v19 = vadd.s32 %v495_v0, %v491_v35 }
  0xe5   : > { %vm603_vm3 = vcmp.lt.s32.totalorder %v2983_v34, 1  ;;  %v839_v51 = vor.u32 %v838_v12, %v837_v59  ;;  %v842_v8 = vshll.u32 %v841_v28, 23  ;;  %v474_v23 = vshrl.u32 %v3140_v43, 16 }
  0xe6   : > { %v497_v5 = vshll.u32 %v493_v36, 16  ;;  %vm728_vm6 = vcmp.lt.s32.totalorder %v2869_v45, 0  ;;  %vm984_vm7 = vcmp.lt.s32.totalorder %v3178_v46, 0  ;;  %v985_v57 = vsub.s32 0, %v3178_v46 }
  0xe7   : > { %v432_v11 = vshrl.u32 %v4477_v18, %v2873_v63  ;;  %v502_v52 = vadd.s32 %v500_v31, %v494_v25  ;;  %v4496_v24 = vand.u32 2147483647, %v2869_v45  ;;  %v843_v13 = vor.u32 4788187, %v842_v8 }
  0xe8   : > { %v453_v43 = vsel %vm451_vm2, %v2912_v41, 2102212464  ;;  %v485_v29 = vadd.s32 %v484_v49, %v474_v23  ;;  %vm503_vm9 = vc.u32 %v501_v19, %v497_v5  ;;  %v986_v48 = vsel %vm984_vm7, %v985_v57, %v3178_v46 }
  0xe9   : > { %vm3191_vm8 = vcmp.le.f32.partialorder %v4496_v24, 0.7853982  ;;  %v476_v10 = vshrl.u32 %v3143_v60, 16  ;;  %v496_v0 = vshrl.u32 %v492_v15, 16  ;;  %v504_v63 = vsel %vm503_vm9, 1, %v4480_v3 }
  0xea   : > { %v844_v50 = vand.u32 2147483647, %v843_v13  ;;  %v846_v17 = vcvt.s32.f32 %v839_v51  ;;  %v987_v56 = vclz %v986_v48  ;;  %v506_v58 = vadd.s32 %v504_v63, %v502_v52 }
  0xeb   : > { %vm606_vm10 = vcmp.lt.s32.totalorder %v2983_v34, 4  ;;  %v452_v42 = vsel %vm448_vm4, %v432_v11, %v2905_v38  ;;  %v454_v41 = vsel %vm450_vm5, %v2910_v40, %v453_v43  ;;  %v498_v35 = vshrl.u32 %v493_v36, 16 }
  0xec   : > { %v847_v59 = vmul.f32 %v846_v17, %v844_v50  ;;  %v2528_v60 = vadd.s32 4294967294, %v987_v56  ;;  %v3208_v15 = vadd.s32 %v485_v29, %v476_v10  ;;  %v507_v33 = vadd.s32 %v506_v58, %v496_v0 }
  0xed   : > { %v599_v12 = vor.u32 %v3155_v54, %v3151_v62  ;;  %vm605_vm2 = vcmp.lt.s32.totalorder %v2983_v34, 3  ;;  %v616_v28 = vsel %vm606_vm10, %v602_v16, 1326507024  ;;  %v850_v38 = vsub.s32 4, %v3106_v21 }
  0xee   : > { %vm883_vm4 = vcmp.lt.s32.totalorder %v2877_v1, 0  ;;  %v848_v49 = vxor.u32 2147483648, %v847_v59  ;;  %vm2529_vm5 = vcmp.lt.s32.totalorder %v2528_v60, 0  ;;  %v3217_v40 = vadd.s32 %v501_v19, %v497_v5 }
  0xef   : > { %v508_v36 = vadd.s32 %v507_v33, %v498_v35  ;;  %v615_v25 = vsel %vm603_vm3, %v3145_v55, %v3175_v44  ;;  %v975_v62 = vadd.s32 %v3125_v14, %v3111_v4  ;;  %v990_v54 = vsel %vm2529_vm5, 0, %v2528_v60 }
  0xf0   : > { %v455_v16 = vsel %vm449_vm15, %v452_v42, %v454_v41  ;;  %v849_v31 = vsel %vm728_vm6, %v848_v49, %v847_v59  ;;  %v991_v51 = vsub.s32 32, %v990_v54  ;;  %v995_v8 = vsub.s32 4294967266, %v990_v54 }
  0xf1   : > { %vm511_vm11 = vc.u32 %v3208_v15, %v3217_v40  ;;  %v617_v19 = vsel %vm605_vm2, %v599_v12, %v616_v28  ;;  %v851_v23 = vsel %vm728_vm6, %v850_v38, %v3106_v21  ;;  %v3239_v9 = vsel %vm3191_vm8, %v2869_v45, %v849_v31 }
  0xf2   : > { %v512_v4 = vadd.s32 1, %v508_v36  ;;  %v3243_v14 = vmul.f32 %v3239_v9, %v3239_v9  ;;  %v992_v5 = vshll.u32 %v3178_v46, %v990_v54  ;;  %v993_v57 = vshrl.u32 %v975_v62, %v991_v51 }
  0xf3   : > { %v996_v11 = vadd.s32 127, %v995_v8  ;;  %v1005_v52 = vsub.s32 4, %v3170_v37  ;;  %v509_v24 = vmul.u32 %v2908_v39, %v455_v16  ;;  %vm604_vm15 = vcmp.lt.s32.totalorder %v2983_v34, 2 }
  0xf4   : > { %v513_v13 = vsel %vm511_vm11, %v512_v4, %v508_v36  ;;  %v855_v21 = vmul.f32 -0.001358992, %v3243_v14  ;;  %v862_v43 = vmul.f32 -0.00019511016, %v3243_v14  ;;  %v994_v29 = vor.u32 %v993_v57, %v992_v5 }
  0xf5   : > { %v997_v48 = vshll.u32 %v996_v11, 23  ;;  %v3252_v10 = vand.u32 65535, %v2975_v27  ;;  %v853_v46 = vsel %vm3191_vm8, 0, %v851_v23  ;;  %v514_v0 = vadd.s32 %v513_v13, %v509_v24 }
  0xf6   : > { %v618_v63 = vsel %vm604_vm15, %v615_v25, %v617_v19  ;;  %v3260_v39 = vor.u32 %v3099_v26, %v3095_v22  ;;  %v856_v50 = vadd.f32 0.041655596, %v855_v21  ;;  %v863_v17 = vadd.f32 0.008332121, %v862_v43 }
  0xf7   : > { %v998_v56 = vor.u32 4788187, %v997_v48  ;;  %v612_v58 = vsel %vm606_vm10, %v599_v12, 920167782  ;;  %v1006_v42 = vsel %vm883_vm4, %v1005_v52, %v3170_v37  ;;  %v515_v61 = vadd.s32 536870912, %v514_v0 }
  0xf8   : > { %v623_v41 = vshrl.u32 %v618_v63, 16  ;;  %v864_v35 = vmul.f32 %v863_v17, %v3243_v14  ;;  %v1001_v60 = vcvt.s32.f32 %v994_v29  ;;  %v622_v33 = vand.u32 65535, %v618_v63 }
  0xf9   : > { %v999_v59 = vand.u32 2147483647, %v998_v56  ;;  %v870_v28 = vadd.s32 3, %v853_v46  ;;  %v4499_v22 = vand.u32 2147483647, %v2877_v1  ;;  %v3274_v38 = vshrl.u32 %v515_v61, 30 }
  0xfa   : > { %v3277_v12 = vmul.u32 %v623_v41, %v3252_v10  ;;  %v857_v37 = vmul.f32 %v856_v50, %v3243_v14  ;;  %v865_v49 = vadd.f32 -0.16666654, %v864_v35  ;;  %v3283_v62 = vshrl.u32 %v2975_v27, 16 }
  0xfb   : > { %vm3270_vm12 = vcmp.le.f32.partialorder %v4499_v22, 0.7853982  ;;  %v1002_v36 = vmul.f32 %v1001_v60, %v999_v59  ;;  %v517_v54 = vshll.u32 %v3274_v38, 30  ;;  %v611_v31 = vsel %vm603_vm3, %v3260_v39, %v3145_v55 }
  0xfc   : > { %v1008_v25 = vsel %vm3270_vm12, 0, %v1006_v42  ;;  %v628_v16 = vshll.u32 %v3277_v12, 16  ;;  %v866_v51 = vmul.f32 %v865_v49, %v3243_v14  ;;  %v624_v19 = vmul.u32 %v622_v33, %v3252_v10 }
  0xfd   : > { %v1003_v8 = vxor.u32 2147483648, %v1002_v36  ;;  %v613_v23 = vsel %vm605_vm2, %v3175_v44, %v612_v58  ;;  %v3296_v4 = vand.u32 3, %v870_v28  ;;  %v1025_v5 = vadd.s32 3, %v1008_v25 }
  0xfe   : > { %v3298_v57 = vsub.s32 %v514_v0, %v517_v54  ;;  %v858_v11 = vadd.f32 -0.4999988, %v857_v37  ;;  %v3303_v24 = vmul.u32 %v622_v33, %v3283_v62  ;;  %vm632_vm13 = vc.u32 %v624_v19, %v628_v16 }
  0xff   : > { %v1004_v52 = vsel %vm883_vm4, %v1003_v8, %v1002_v36  ;;  %v867_v13 = vadd.f32 1.0, %v866_v51  ;;  %v3314_v48 = vand.u32 3, %v1025_v5  ;;  %v614_v0 = vsel %vm604_vm15, %v611_v31, %v613_v23 }
 0x100   : > { %v3308_v21 = vsel %vm3270_vm12, %v2877_v1, %v1004_v52  ;;  %vm519_vm14 = vcmp.lt.s32.totalorder %v3298_v57, 0  ;;  %v520_v43 = vsub.s32 0, %v3298_v57  ;;  %v634_v63 = vadd.s32 %v628_v16, %v624_v19 }
 0x101   : > { %v1009_v29 = vmul.f32 %v3308_v21, %v3308_v21  ;;  %vm873_vm0 = vcmp.eq.s32.totalorder %v3296_v4, 0  ;;  %v630_v56 = vshll.u32 %v3303_v24, 16  ;;  %v633_v58 = vsel %vm632_vm13, 1, %v4480_v3 }
 0x102   : > { %v521_v46 = vsel %vm519_vm14, %v520_v43, %v3298_v57  ;;  %v859_v42 = vmul.f32 %v858_v11, %v3243_v14  ;;  %v868_v61 = vmul.f32 %v867_v13, %v3239_v9  ;;  %v627_v59 = vmul.u32 %v623_v41, %v3283_v62 }
 0x103   : > { %v1010_v50 = vmul.f32 -0.001358992, %v1009_v29  ;;  %v1017_v17 = vmul.f32 -0.00019511016, %v1009_v29  ;;  %v522_v35 = vclz %v521_v46  ;;  %v510_v28 = vadd.s32 %v3217_v40, %v3208_v15 }
 0x104   : > { %vm636_vm1 = vc.u32 %v634_v63, %v630_v56  ;;  %v635_v26 = vadd.s32 %v633_v58, %v627_v59  ;;  %v644_v37 = vand.u32 65535, %v614_v0  ;;  %v645_v49 = vshrl.u32 %v614_v0, 16 }
 0x105   : > { %v1011_v60 = vadd.f32 0.041655596, %v1010_v50  ;;  %v1018_v33 = vadd.f32 0.008332121, %v1017_v17  ;;  %v2519_v22 = vadd.s32 4294967294, %v522_v35  ;;  %vm876_vm6 = vcmp.eq.s32.totalorder %v3296_v4, 2 }
 0x106   : > { %v587_v9 = vshrl.u32 %v4477_v18, %v3034_v47  ;;  %v637_v14 = vsel %vm636_vm1, 1, %v4480_v3  ;;  %v860_v41 = vadd.f32 1.0, %v859_v42  ;;  %vm872_vm7 = vcmp.lt.s32.totalorder %v3296_v4, 2 }
 0x107   : > { %v1012_v36 = vmul.f32 %v1011_v60, %v1009_v29  ;;  %v1019_v25 = vmul.f32 %v1018_v33, %v1009_v29  ;;  %v874_v54 = vxor.u32 2147483648, %v868_v61  ;;  %vm2520_vm8 = vcmp.lt.s32.totalorder %v2519_v22, 0 }
 0x108   : > { %v647_v15 = vmul.u32 %v645_v49, %v3252_v10  ;;  %v525_v31 = vsel %vm2520_vm8, 0, %v2519_v22  ;;  %v607_v51 = vsel %vm603_vm3, %v587_v9, %v3260_v39  ;;  %vm1028_vm9 = vcmp.eq.s32.totalorder %v3314_v48, 0 }
 0x109   : > { %v1013_v40 = vadd.f32 -0.4999988, %v1012_v36  ;;  %v1020_v16 = vadd.f32 -0.16666654, %v1019_v25  ;;  %vm1031_vm4 = vcmp.eq.s32.totalorder %v3314_v48, 2  ;;  %v530_v47 = vsub.s32 4294967266, %v525_v31 }
 0x10a   : > { %v629_v8 = vshrl.u32 %v3277_v12, 16  ;;  %v639_v19 = vadd.s32 %v637_v14, %v635_v26  ;;  %v648_v23 = vmul.u32 %v644_v37, %v3283_v62  ;;  %vm1027_vm5 = vcmp.lt.s32.totalorder %v3314_v48, 2 }
 0x10b   : > { %v1014_v5 = vmul.f32 %v1013_v40, %v1009_v29  ;;  %v1021_v11 = vmul.f32 %v1020_v16, %v1009_v29  ;;  %v646_v52 = vmul.u32 %v644_v37, %v3252_v10  ;;  %v650_v13 = vshll.u32 %v647_v15, 16 }
 0x10c   : > { %vm869_vm11 = vweird.f32 %v2869_v45  ;;  %v875_v39 = vsel %vm873_vm0, %v860_v41, %v874_v54  ;;  %v877_v43 = vxor.u32 2147483648, %v860_v41  ;;  %vm1024_vm3 = vweird.f32 %v2877_v1 }
 0x10d   : > { %v526_v46 = vsub.s32 32, %v525_v31  ;;  %v531_v12 = vadd.s32 127, %v530_v47  ;;  %v1015_v0 = vadd.f32 1.0, %v1014_v5  ;;  %v1022_v63 = vadd.f32 1.0, %v1021_v11 }
 0x10e   : > { %v649_v50 = vmul.u32 %v645_v49, %v3283_v62  ;;  %vm654_vm12 = vc.u32 %v646_v52, %v650_v13  ;;  %v652_v17 = vshll.u32 %v648_v23, 16  ;;  %v656_v56 = vadd.s32 %v650_v13, %v646_v52 }
 0x10f   : > { %v532_v29 = vshll.u32 %v531_v12, 23  ;;  %v655_v10 = vsel %vm654_vm12, 1, %v4480_v3  ;;  %v1023_v58 = vmul.f32 %v1022_v63, %v3308_v21  ;;  %v1032_v42 = vxor.u32 2147483648, %v1015_v0 }
 0x110   : > { %v640_v35 = vadd.s32 %v639_v19, %v629_v8  ;;  %v657_v59 = vadd.s32 %v655_v10, %v649_v50  ;;  %v878_v60 = vsel %vm876_vm6, %v877_v43, %v868_v61  ;;  %v528_v33 = vshrl.u32 %v510_v28, %v526_v46 }
 0x111   : > { %v608_v22 = vsel %vm606_vm10, %v3175_v44, 2102212464  ;;  %vm658_vm13 = vc.u32 %v656_v56, %v652_v17  ;;  %v879_v62 = vsel %vm872_vm7, %v875_v39, %v878_v60  ;;  %v1029_v26 = vxor.u32 2147483648, %v1023_v58 }
 0x112   : > { %v631_v37 = vshrl.u32 %v3303_v24, 16  ;;  %v659_v21 = vsel %vm658_vm13, 1, %v4480_v3  ;;  %v527_v49 = vshll.u32 %v3298_v57, %v525_v31  ;;  %v533_v36 = vor.u32 4788187, %v532_v29 }
 0x113   : > { %v651_v25 = vshrl.u32 %v647_v15, 16  ;;  %v661_v9 = vadd.s32 %v659_v21, %v657_v59  ;;  %v1030_v61 = vsel %vm1028_vm9, %v1015_v0, %v1029_v26  ;;  %v1033_v44 = vsel %vm1031_vm4, %v1032_v42, %v1023_v58 }
 0x114   : > { %v609_v4 = vsel %vm605_vm2, %v3145_v55, %v608_v22  ;;  %v641_v28 = vadd.s32 %v640_v35, %v631_v37  ;;  %v1034_v24 = vsel %vm1027_vm5, %v1030_v61, %v1033_v44  ;;  %v529_v14 = vor.u32 %v528_v33, %v527_v49 }
 0x115   : > { %v653_v41 = vshrl.u32 %v648_v23, 16  ;;  %v662_v57 = vadd.s32 %v661_v9, %v651_v25  ;;  %v880_v54 = vsel %vm869_vm11, nan, %v879_v62  ;;  %v1035_v15 = vsel %vm1024_vm3, nan, %v1034_v24 }
 0x116   : > { %v660_v40 = vadd.s32 %v656_v56, %v652_v17  ;;  %v1041_v16 = vpack.c.bf16 %v1035_v15, %v880_v54  ;;  %v534_v31 = vand.u32 2147483647, %v533_v36  ;;  %v610_v47 = vsel %vm604_vm15, %v607_v51, %v609_v4 }
 0x117   : > { %v663_v55 = vadd.s32 %v662_v57, %v653_v41  ;;  %v536_v48 = vcvt.s32.f32 %v529_v14  ;;  %v664_v19 = vmul.u32 %v2975_v27, %v610_v47  ;;  %vm418_vm2 = vcmp.lt.s32.totalorder %v2866_v32, 0 }
 0x118   : > { %vm666_vm10 = vc.u32 %v641_v28, %v660_v40  ;;  %1089 = vmatpush.bf16.msra.mxu0 %v1041_v16  ;;  %2583 = vmatpush.bf16.msra.mxu3 %v1041_v16  ;;  %v4502_v39 = vand.u32 2147483647, %v2866_v32  ;;  %v665_v10 = vadd.s32 %v660_v40, %v641_v28  ;;  %v540_v61 = vsub.s32 4, %v3274_v38 }
 0x119   : > { %v667_v8 = vadd.s32 1, %v663_v55  ;;  %v537_v23 = vmul.f32 %v536_v48, %v534_v31  ;;  %vm573_vm1 = vcmp.lt.s32.totalorder %v2879_v2, 0  ;;  %v4505_v24 = vand.u32 2147483647, %v2879_v2 }
 0x11a   : > { %vm3380_vm15 = vcmp.le.f32.partialorder %v4502_v39, 0.7853982  ;;  %v541_v57 = vsel %vm418_vm2, %v540_v61, %v3274_v38  ;;  %vm559_vm3 = vweird.f32 %v2866_v32  ;;  %vm714_vm12 = vweird.f32 %v2879_v2 }
 0x11b   : > { %v668_v45 = vsel %vm666_vm10, %v667_v8, %v663_v55  ;;  %v538_v1 = vxor.u32 2147483648, %v537_v23  ;;  %vm3391_vm6 = vcmp.le.f32.partialorder %v4505_v24, 0.7853982  ;;  %v543_v31 = vsel %vm3380_vm15, 0, %v541_v57 }
 0x11c   : > { %v669_v5 = vadd.s32 %v668_v45, %v664_v19  ;;  %vm1076_vm13 = vcmask 261120  }
 0x11d   : > { %v539_v34 = vsel %vm418_vm2, %v538_v1, %v537_v23 }
 0x11e   : > { %v670_v11 = vadd.s32 536870912, %v669_v5  ;;  %v542_v27 = vsel %vm3380_vm15, %v2866_v32, %v539_v34  ;;  %v1059_v32 = vpop.permute.xlu1 %1058 }
 0x11f   : > { %v544_v0 = vmul.f32 %v542_v27, %v542_v27 }
 0x120   : > { %v671_v52 = vshrl.u32 %v670_v11, 30 }
 0x121   : > { %v552_v29 = vmul.f32 -0.00019511016, %v544_v0  ;;  %v545_v33 = vmul.f32 -0.001358992, %v544_v0 }
 0x122   : > { %v672_v13 = vshll.u32 %v671_v52, 30  ;;  %v695_v54 = vsub.s32 4, %v671_v52 }
 0x123   : > { %v553_v42 = vadd.f32 0.008332121, %v552_v29  ;;  %v546_v21 = vadd.f32 0.041655596, %v545_v33 }
 0x124   : > { %v673_v51 = vsub.s32 %v669_v5, %v672_v13  ;;  %v696_v8 = vsel %vm573_vm1, %v695_v54, %v671_v52  ;;  %v560_v5 = vadd.s32 3, %v543_v31 }
 0x125   : > { %v554_v26 = vmul.f32 %v553_v42, %v544_v0  ;;  %v547_v44 = vmul.f32 %v546_v21, %v544_v0  ;;  %v698_v38 = vsel %vm3391_vm6, 0, %v696_v8  ;;  %v2580_v21 = vld [vmem:[%s4452_s3 + $0x8] sm:$0xff] }
 0x126   : > { %vm674_vm14 = vcmp.lt.s32.totalorder %v673_v51, 0  ;;  %v675_v46 = vsub.s32 0, %v673_v51  ;;  %v715_v43 = vadd.s32 3, %v698_v38 }
 0x127   : > { %v555_v25 = vadd.f32 -0.16666654, %v554_v26  ;;  %v548_v40 = vadd.f32 -0.4999988, %v547_v44 }
 0x128   : > { %v676_v12 = vsel %vm674_vm14, %v675_v46, %v673_v51  ;;  %v561_v46 = vand.u32 3, %v560_v5 }
 0x129   : > { %v677_v63 = vclz %v676_v12  ;;  %v556_v28 = vmul.f32 %v555_v25, %v544_v0  ;;  %v549_v19 = vmul.f32 %v548_v40, %v544_v0 }
 0x12a   : > { %vm563_vm7 = vcmp.eq.s32.totalorder %v561_v46, 0  ;;  %vm566_vm8 = vcmp.eq.s32.totalorder %v561_v46, 2  ;;  %vm562_vm9 = vcmp.lt.s32.totalorder %v561_v46, 2 }
 0x12b   : > { %v2522_v50 = vadd.s32 4294967294, %v677_v63  ;;  %v557_v47 = vadd.f32 1.0, %v556_v28  ;;  %v550_v34 = vadd.f32 1.0, %v549_v19 }
 0x12d   : > { %vm2523_vm0 = vcmp.lt.s32.totalorder %v2522_v50, 0  ;;  %v558_v11 = vmul.f32 %v557_v47, %v542_v27  ;;  %v567_v29 = vxor.u32 2147483648, %v550_v34 }
 0x12e   : > { %v680_v17 = vsel %vm2523_vm0, 0, %v2522_v50 }
 0x12f   : > { %v681_v56 = vsub.s32 32, %v680_v17  ;;  %v685_v58 = vsub.s32 4294967266, %v680_v17  ;;  %v682_v35 = vshll.u32 %v673_v51, %v680_v17  ;;  %v564_v12 = vxor.u32 2147483648, %v558_v11 }
 0x130   : > { %v716_v17 = vand.u32 3, %v715_v43 }
 0x131   : > { %v683_v59 = vshrl.u32 %v665_v10, %v681_v56  ;;  %v686_v60 = vadd.s32 127, %v685_v58  ;;  %v565_v10 = vsel %vm563_vm7, %v550_v34, %v564_v12  ;;  %v568_v58 = vsel %vm566_vm8, %v567_v29, %v558_v11 }
 0x132   : > { %vm718_vm4 = vcmp.eq.s32.totalorder %v716_v17, 0  ;;  %vm721_vm5 = vcmp.eq.s32.totalorder %v716_v17, 2  ;;  %vm717_vm11 = vcmp.lt.s32.totalorder %v716_v17, 2 }
 0x133   : > { %v684_v22 = vor.u32 %v683_v59, %v682_v35  ;;  %v687_v62 = vshll.u32 %v686_v60, 23  ;;  %v569_v35 = vsel %vm562_vm9, %v565_v10, %v568_v58 }
 0x135   : > { %v688_v37 = vor.u32 4788187, %v687_v62  ;;  %v691_v36 = vcvt.s32.f32 %v684_v22  ;;  %v570_v22 = vsel %vm559_vm3, nan, %v569_v35 }
 0x137   : > { %v689_v49 = vand.u32 2147483647, %v688_v37  ;;  %v2579_v37 = vld [vmem:[%s4452_s3] sm:$0xff] }
 0x139   : > { %v692_v9 = vmul.f32 %v691_v36, %v689_v49  ;;  %v1049_v49 = vpop.permute.xlu1 %1048 }
 0x13b   : > { %v693_v4 = vxor.u32 2147483648, %v692_v9 }
 0x13d   : > { %v694_v41 = vsel %vm573_vm1, %v693_v4, %v692_v9 }
 0x13e   : > { %v697_v15 = vsel %vm3391_vm6, %v2879_v2, %v694_v41  ;;  %v1064_v2 = vpop.permute.xlu2 %1063 }
 0x13f   : > { %v699_v16 = vmul.f32 %v697_v15, %v697_v15 }
 0x141   : > { %v700_v55 = vmul.f32 -0.001358992, %v699_v16  ;;  %v707_v48 = vmul.f32 -0.00019511016, %v699_v16 }
 0x143   : > { %v701_v23 = vadd.f32 0.041655596, %v700_v55  ;;  %v708_v45 = vadd.f32 0.008332121, %v707_v48 }
 0x145   : > { %v702_v1 = vmul.f32 %v701_v23, %v699_v16  ;;  %v709_v13 = vmul.f32 %v708_v45, %v699_v16 }
 0x146   : > { %v1054_v14 = vpop.permute.xlu2 %1053 }
 0x147   : > { %v703_v51 = vadd.f32 -0.4999988, %v702_v1  ;;  %v710_v39 = vadd.f32 -0.16666654, %v709_v13 }
 0x149   : > { %v704_v63 = vmul.f32 %v703_v51, %v699_v16  ;;  %v711_v50 = vmul.f32 %v710_v39, %v699_v16 }
 0x14b   : > { %v705_v52 = vadd.f32 1.0, %v704_v63  ;;  %v712_v0 = vadd.f32 1.0, %v711_v50 }
 0x14d   : > { %v713_v27 = vmul.f32 %v712_v0, %v697_v15  ;;  %v722_v56 = vxor.u32 2147483648, %v705_v52 }
 0x14f   : > { %v719_v42 = vxor.u32 2147483648, %v713_v27  ;;  %v723_v60 = vsel %vm721_vm5, %v722_v56, %v713_v27 }
 0x151   : > { %v720_v59 = vsel %vm718_vm4, %v705_v52, %v719_v42 }
 0x152   : > { %v724_v33 = vsel %vm717_vm11, %v720_v59, %v723_v60 }
 0x153   : > { %v725_v62 = vsel %vm714_vm12, nan, %v724_v33 }
 0x154   : > { %v1040_v26 = vpack.c.bf16 %v725_v62, %v570_v22 }
 0x156   : > { %1090 = vmatpush.bf16.msra.mxu0 %v1040_v26  ;;  %2584 = vmatpush.bf16.msra.mxu3 %v1040_v26 }
 0x159   : > { %2538 = vmatmul.msk.bf16.vlgmr.msra.gmra.mxu0 %vm1076_vm13, %v2579_v37  ;;  %2539 = vmatmul.msk.bf16.vlgmr.msra.gmra.mxu3 %vm1076_vm13, %v2580_v21 }
 0x1d6   : > { %v1092_v36 = vpop.f32.mrf.mxu0 }
 0x1d7   : > { %v3415_v25 = vadd.f32 %v1092_v36, %v1049_v49 }
 0x1d9   : > { %v1105_v9 = vand.u32 2139095040, %v3415_v25  ;;  %v4472_v48 = vand.u32 2147483647, %v3415_v25 }
 0x1db   : > { %v1106_v61 = vshrl.u32 %v1105_v9, 23  ;;  %v1109_v34 = vand.u32 8388607, %v4472_v48 }
 0x1dc   : > { %v1097_v44 = vpop.f32.mrf.mxu3 }
 0x1dd   : > { %v2540_v4 = vadd.s32 4294967169, %v1106_v61  ;;  %v3418_v28 = vadd.f32 %v1097_v44, %v1059_v32  ;;  %v1110_v17 = vor.u32 8388608, %v1109_v34 }
 0x1de   : > { %v1094_v24 = vpop.f32.mrf.mxu0 }
 0x1df   : > { %v1112_v41 = vadd.s32 1, %v2540_v4  ;;  %v1415_v57 = vand.u32 2139095040, %v3418_v28  ;;  %v3421_v54 = vadd.f32 %v1094_v24, %v1054_v14  ;;  %v3466_v32 = vshll.u32 %v1110_v17, 8 }
 0x1e0   : > { %v4473_v14 = vand.u32 2147483647, %v3418_v28 }
 0x1e1   : > { %vm1113_vm10 = vcmp.gt.s32.totalorder %v1112_v41, 0  ;;  %v1416_v15 = vshrl.u32 %v1415_v57, 23  ;;  %v1260_v31 = vand.u32 2139095040, %v3421_v54  ;;  %v4471_v27 = vand.u32 2147483647, %v3421_v54 }
 0x1e2   : > { %v1114_v40 = vsel %vm1113_vm10, %v1112_v41, 0  ;;  %v3484_v57 = vand.u32 65535, %v3466_v32 }
 0x1e3   : > { %v1116_v16 = vand.u32 31, %v1114_v40  ;;  %v2546_v55 = vadd.s32 4294967169, %v1416_v15  ;;  %v3425_v8 = vshrl.u32 %v1114_v40, 5  ;;  %v1261_v45 = vshrl.u32 %v1260_v31, 23 }
 0x1e4   : > { %v1099_v60 = vpop.f32.mrf.mxu3  ;;  %v1264_v62 = vand.u32 8388607, %v4471_v27 }
 0x1e5   : > { %v1117_v47 = vsub.s32 32, %v1116_v16  ;;  %v1131_v19 = vshll.u32 %v4494_v53, %v1116_v16  ;;  %v1422_v1 = vadd.s32 1, %v2546_v55  ;;  %v1122_v51 = vshll.u32 %v4475_v20, %v1116_v16 }
 0x1e6   : > { %v1125_v39 = vshll.u32 %v4492_v7, %v1116_v16  ;;  %v1128_v46 = vshll.u32 %v4493_v30, %v1116_v16  ;;  %v2543_v12 = vadd.s32 4294967169, %v1261_v45  ;;  %vm1137_vm15 = vcmp.lt.s32.totalorder %v3425_v8, 4 }
 0x1e7   : > { %v1132_v23 = vshrl.u32 %v4495_v6, %v1117_v47  ;;  %v1123_v5 = vshrl.u32 %v4492_v7, %v1117_v47  ;;  %v1126_v11 = vshrl.u32 %v4493_v30, %v1117_v47  ;;  %v1129_v38 = vshrl.u32 %v4494_v53, %v1117_v47 }
 0x1e8   : > { %v1120_v43 = vshrl.u32 %v4475_v20, %v1117_v47  ;;  %vm1423_vm2 = vcmp.gt.s32.totalorder %v1422_v1, 0  ;;  %v1119_v10 = vshll.u32 %v4477_v18, %v1116_v16  ;;  %vm1134_vm14 = vcmp.lt.s32.totalorder %v3425_v8, 1 }
 0x1e9   : > { %v1133_v13 = vor.u32 %v1132_v23, %v1131_v19  ;;  %v1124_v63 = vor.u32 %v1123_v5, %v1122_v51  ;;  %v1127_v50 = vor.u32 %v1126_v11, %v1125_v39  ;;  %v1130_v29 = vor.u32 %v1129_v38, %v1128_v46 }
 0x1ea   : > { %v1424_v0 = vsel %vm1423_vm2, %v1422_v1, 0  ;;  %vm1136_vm0 = vcmp.lt.s32.totalorder %v3425_v8, 3  ;;  %v1267_v56 = vadd.s32 1, %v2543_v12  ;;  %v1121_v58 = vor.u32 %v1120_v43, %v1119_v10 }
 0x1eb   : > { %v1147_v52 = vsel %vm1137_vm15, %v1133_v13, 1326507024  ;;  %v1146_v42 = vsel %vm1134_vm14, %v1124_v63, %v1127_v50  ;;  %v3449_v59 = vand.u32 31, %v1424_v0  ;;  %v1143_v33 = vsel %vm1137_vm15, %v1130_v29, 920167782 }
 0x1ec   : > { %v1148_v35 = vsel %vm1136_vm0, %v1130_v29, %v1147_v52  ;;  %vm1135_vm1 = vcmp.lt.s32.totalorder %v3425_v8, 2  ;;  %vm1268_vm6 = vcmp.gt.s32.totalorder %v1267_v56, 0  ;;  %v3460_v26 = vadd.f32 %v1099_v60, %v1064_v2 }
 0x1ed   : > { %v3456_v22 = vsel %vm1135_vm1, %v1146_v42, %v1148_v35  ;;  %v1142_v37 = vsel %vm1134_vm14, %v1121_v58, %v1124_v63  ;;  %v1144_v21 = vsel %vm1136_vm0, %v1127_v50, %v1143_v33  ;;  %v3469_v49 = vsub.s32 32, %v3449_v59 }
 0x1ee   : > { %v1118_v36 = vshrl.u32 %v4477_v18, %v1117_v47  ;;  %v1139_v9 = vsel %vm1137_vm15, %v1127_v50, 2102212464  ;;  %v1154_v61 = vshrl.u32 %v3456_v22, 16  ;;  %v1269_v2 = vsel %vm1268_vm6, %v1267_v56, 0 }
 0x1ef   : > { %v3477_v44 = vsel %vm1135_vm1, %v1142_v37, %v1144_v21  ;;  %v1265_v4 = vor.u32 8388608, %v1264_v62  ;;  %v1570_v24 = vand.u32 2139095040, %v3460_v26  ;;  %v3486_v15 = vshrl.u32 %v1424_v0, 5 }
 0x1f0   : > { %v1138_v41 = vsel %vm1134_vm14, %v1118_v36, %v1121_v58  ;;  %v1439_v40 = vshrl.u32 %v4494_v53, %v3469_v49  ;;  %v1140_v16 = vsel %vm1136_vm0, %v1124_v63, %v1139_v9  ;;  %v4474_v31 = vand.u32 65535, %v3456_v22 }
 0x1f1   : > { %v1442_v47 = vshrl.u32 %v4495_v6, %v3469_v49  ;;  %v1271_v55 = vand.u32 31, %v1269_v2  ;;  %v3496_v19 = vshrl.u32 %v3466_v32, 16  ;;  %v3499_v23 = vmul.u32 %v1154_v61, %v3484_v57 }
 0x1f2   : > { %v1176_v45 = vshrl.u32 %v3477_v44, 16  ;;  %v1438_v5 = vshll.u32 %v4493_v30, %v3449_v59  ;;  %v1441_v11 = vshll.u32 %v4494_v53, %v3449_v59  ;;  %v3506_v38 = vshll.u32 %v1265_v4, 8 }
 0x1f3   : > { %v1571_v1 = vshrl.u32 %v1570_v24, 23  ;;  %v3510_v13 = vand.u32 8388607, %v4473_v14  ;;  %v3514_v34 = vsel %vm1135_vm1, %v1138_v41, %v1140_v16  ;;  %vm1447_vm7 = vcmp.lt.s32.totalorder %v3486_v15, 4 }
 0x1f4   : > { %v1440_v39 = vor.u32 %v1439_v40, %v1438_v5  ;;  %v3521_v46 = vmul.u32 %v4474_v31, %v3484_v57  ;;  %v1443_v43 = vor.u32 %v1442_v47, %v1441_v11  ;;  %v3523_v12 = vsub.s32 32, %v1271_v55 }
 0x1f5   : > { %v2549_v63 = vadd.s32 4294967169, %v1571_v1  ;;  %v3526_v50 = vmul.u32 %v1154_v61, %v3496_v19  ;;  %v3530_v29 = vmul.u32 %v1176_v45, %v3484_v57  ;;  %v3533_v52 = vmul.u32 %v1176_v45, %v3496_v19 }
 0x1f6   : > { %v3535_v0 = vshrl.u32 %v1269_v2, 5  ;;  %v3538_v17 = vand.u32 65535, %v3506_v38  ;;  %v1420_v56 = vor.u32 8388608, %v3510_v13  ;;  %v1453_v58 = vsel %vm1447_vm7, %v1440_v39, 920167782 }
 0x1f7   : > { %v1577_v10 = vadd.s32 1, %v2549_v63  ;;  %v1274_v42 = vshll.u32 %v4477_v18, %v1271_v55  ;;  %v1277_v35 = vshll.u32 %v4475_v20, %v1271_v55  ;;  %v1280_v60 = vshll.u32 %v4492_v7, %v1271_v55 }
 0x1f8   : > { %v1457_v33 = vsel %vm1447_vm7, %v1443_v43, 1326507024  ;;  %v1275_v62 = vshrl.u32 %v4475_v20, %v3523_v12  ;;  %v1430_v37 = vshrl.u32 %v4475_v20, %v3469_v49  ;;  %v1278_v21 = vshrl.u32 %v4492_v7, %v3523_v12 }
 0x1f9   : > { %vm1578_vm8 = vcmp.gt.s32.totalorder %v1577_v10, 0  ;;  %v1281_v36 = vshrl.u32 %v4493_v30, %v3523_v12  ;;  %v1283_v9 = vshll.u32 %v4493_v30, %v1271_v55  ;;  %v1429_v61 = vshll.u32 %v4477_v18, %v3449_v59 }
 0x1fa   : > { %v3560_v2 = vshll.u32 %v4494_v53, %v1271_v55  ;;  %v1579_v4 = vsel %vm1578_vm8, %v1577_v10, 0  ;;  %v1432_v24 = vshll.u32 %v4475_v20, %v3449_v59  ;;  %v1433_v41 = vshrl.u32 %v4492_v7, %v3469_v49 }
 0x1fb   : > { %v1284_v40 = vshrl.u32 %v4494_v53, %v3523_v12  ;;  %v3570_v16 = vshrl.u32 %v4495_v6, %v3523_v12  ;;  %v3572_v47 = vand.u32 31, %v1579_v4  ;;  %v1431_v45 = vor.u32 %v1430_v37, %v1429_v61 }
 0x1fc   : > { %v3574_v5 = vor.u32 %v1275_v62, %v1274_v42  ;;  %vm1289_vm9 = vcmp.lt.s32.totalorder %v3535_v0, 1  ;;  %v1434_v55 = vor.u32 %v1433_v41, %v1432_v24  ;;  %v1435_v11 = vshll.u32 %v4492_v7, %v3449_v59 }
 0x1fd   : > { %v1436_v1 = vshrl.u32 %v4493_v30, %v3469_v49  ;;  %v3581_v13 = vor.u32 %v1278_v21, %v1277_v35  ;;  %v3583_v43 = vor.u32 %v1281_v36, %v1280_v60  ;;  %v3586_v63 = vsub.s32 32, %v3572_v47 }
 0x1fe   : > { %v1428_v10 = vshrl.u32 %v4477_v18, %v3469_v49  ;;  %v1593_v42 = vshll.u32 %v4493_v30, %v3572_v47  ;;  %vm1444_vm4 = vcmp.lt.s32.totalorder %v3486_v15, 1  ;;  %vm1445_vm5 = vcmp.lt.s32.totalorder %v3486_v15, 2 }
 0x1ff   : > { %v1437_v62 = vor.u32 %v1436_v1, %v1435_v11  ;;  %v1594_v59 = vshrl.u32 %v4494_v53, %v3586_v63  ;;  %v1597_v35 = vshrl.u32 %v4495_v6, %v3586_v63  ;;  %vm1446_vm11 = vcmp.lt.s32.totalorder %v3486_v15, 3 }
 0x200   : > { %v1452_v60 = vsel %vm1444_vm4, %v1431_v45, %v1434_v55  ;;  %v1458_v36 = vsel %vm1446_vm11, %v1440_v39, %v1457_v33  ;;  %v3601_v61 = vshrl.u32 %v1579_v4, 5  ;;  %v1596_v24 = vshll.u32 %v4494_v53, %v3572_v47 }
 0x201   : > { %v1449_v49 = vsel %vm1447_vm7, %v1437_v62, 2102212464  ;;  %v1454_v37 = vsel %vm1446_vm11, %v1437_v62, %v1453_v58  ;;  %v1456_v21 = vsel %vm1444_vm4, %v1434_v55, %v1437_v62  ;;  %v1448_v41 = vsel %vm1444_vm4, %v1428_v10, %v1431_v45 }
 0x202   : > { %v1455_v11 = vsel %vm1445_vm5, %v1452_v60, %v1454_v37  ;;  %v3607_v1 = vor.u32 %v1594_v59, %v1593_v42  ;;  %v1450_v27 = vsel %vm1446_vm11, %v1434_v55, %v1449_v49  ;;  %v1459_v48 = vsel %vm1445_vm5, %v1456_v21, %v1458_v36 }
 0x203   : > { %v3611_v14 = vshll.u32 %v1420_v56, 8  ;;  %v1598_v58 = vor.u32 %v1597_v35, %v1596_v24  ;;  %v1463_v62 = vand.u32 65535, %v1459_v48  ;;  %v1464_v39 = vshrl.u32 %v1459_v48, 16 }
 0x204   : > { %v1485_v33 = vand.u32 65535, %v1455_v11  ;;  %v3613_v4 = vor.u32 %v1284_v40, %v1283_v9  ;;  %v1486_v10 = vshrl.u32 %v1455_v11, 16  ;;  %v3623_v56 = vsel %vm1289_vm9, %v3574_v5, %v3581_v13 }
 0x205   : > { %v1461_v51 = vand.u32 65535, %v3611_v14  ;;  %v1462_v45 = vshrl.u32 %v3611_v14, 16  ;;  %vm1602_vm3 = vcmp.lt.s32.totalorder %v3601_v61, 4  ;;  %v3628_v48 = vsel %vm1445_vm5, %v1448_v41, %v1450_v27 }
 0x206   : > { %v1608_v9 = vsel %vm1602_vm3, %v3607_v1, 920167782  ;;  %v4479_v59 = vand.u32 2147483647, %v3460_v26  ;;  %v1612_v35 = vsel %vm1602_vm3, %v1598_v58, 1326507024 }
 0x207   : > { %v1466_v40 = vmul.u32 %v1464_v39, %v1461_v51  ;;  %v1467_v55 = vmul.u32 %v1463_v62, %v1462_v45  ;;  %v1465_v60 = vmul.u32 %v1463_v62, %v1461_v51  ;;  %v1488_v49 = vmul.u32 %v1486_v10, %v1461_v51 }
 0x208   : > { %v1489_v37 = vmul.u32 %v1485_v33, %v1462_v45  ;;  %v1468_v21 = vmul.u32 %v1464_v39, %v1462_v45  ;;  %v1487_v24 = vmul.u32 %v1485_v33, %v1461_v51  ;;  %v1490_v15 = vmul.u32 %v1486_v10, %v1462_v45 }
 0x209   : > { %v1469_v36 = vshll.u32 %v1466_v40, 16  ;;  %v1470_v27 = vshrl.u32 %v1466_v40, 16  ;;  %v1471_v41 = vshll.u32 %v1467_v55, 16  ;;  %v1472_v11 = vshrl.u32 %v1467_v55, 16 }
 0x20a   : > { %v1491_v31 = vshll.u32 %v1488_v49, 16  ;;  %v1492_v42 = vshrl.u32 %v1488_v49, 16  ;;  %v1574_v20 = vand.u32 8388607, %v4479_v59  ;;  %vm1292_vm10 = vcmp.lt.s32.totalorder %v3535_v0, 4 }
 0x20b   : > { %vm1473_vm12 = vc.u32 %v1465_v60, %v1469_v36  ;;  %v1475_v8 = vadd.s32 %v1469_v36, %v1465_v60  ;;  %v1493_v62 = vshll.u32 %v1489_v37, 16  ;;  %v4508_v33 = vmov 683565275  }
 0x20c   : > { %v1474_v58 = vsel %vm1473_vm12, 1, %v4480_v3  ;;  %vm1495_vm2 = vc.u32 %v1487_v24, %v1491_v31  ;;  %v1497_v39 = vadd.s32 %v1491_v31, %v1487_v24  ;;  %v1584_v45 = vshll.u32 %v4508_v33, %v3572_v47 }
 0x20d   : > { %v1476_v18 = vadd.s32 %v1474_v58, %v1468_v21  ;;  %vm1477_vm15 = vc.u32 %v1475_v8, %v1471_v41  ;;  %v1496_v51 = vsel %vm1495_vm2, 1, %v4480_v3  ;;  %v1575_v55 = vor.u32 8388608, %v1574_v20 }
 0x20e   : > { %v1478_v10 = vsel %vm1477_vm15, 1, %v4480_v3  ;;  %v1498_v40 = vadd.s32 %v1496_v51, %v1490_v15  ;;  %vm1499_vm14 = vc.u32 %v1497_v39, %v1493_v62  ;;  %v4509_v36 = vmov 2475754826  }
 0x20f   : > { %v1480_v60 = vadd.s32 %v1478_v10, %v1476_v18  ;;  %v1500_v49 = vsel %vm1499_vm14, 1, %v4480_v3  ;;  %v1585_v59 = vshrl.u32 %v4509_v36, %v3586_v63  ;;  %v1587_v31 = vshll.u32 %v4509_v36, %v3572_v47 }
 0x210   : > { %vm1291_vm0 = vcmp.lt.s32.totalorder %v3535_v0, 3  ;;  %v1502_v8 = vadd.s32 %v1500_v49, %v1498_v40  ;;  %v1588_v21 = vshrl.u32 %v4492_v7, %v3586_v63  ;;  %v1590_v24 = vshll.u32 %v4492_v7, %v3572_v47 }
 0x211   : > { %v1591_v18 = vshrl.u32 %v4493_v30, %v3586_v63  ;;  %v1481_v20 = vadd.s32 %v1480_v60, %v1470_v27  ;;  %v1494_v15 = vshrl.u32 %v1489_v37, 16  ;;  %v3656_v41 = vadd.s32 %v1497_v39, %v1493_v62 }
 0x212   : > { %v1586_v58 = vor.u32 %v1585_v59, %v1584_v45  ;;  %v1503_v51 = vadd.s32 %v1502_v8, %v1492_v42  ;;  %v3658_v10 = vor.u32 %v1588_v21, %v1587_v31  ;;  %vm1599_vm1 = vcmp.lt.s32.totalorder %v3601_v61, 1 }
 0x213   : > { %v1592_v3 = vor.u32 %v1591_v18, %v1590_v24  ;;  %v3661_v40 = vadd.s32 %v1481_v20, %v1472_v11  ;;  %vm1600_vm6 = vcmp.lt.s32.totalorder %v3601_v61, 2  ;;  %vm1601_vm7 = vcmp.lt.s32.totalorder %v3601_v61, 3 }
 0x214   : > { %v3665_v47 = vshll.u32 %v1575_v55, 8  ;;  %v1504_v49 = vadd.s32 %v1503_v51, %v1494_v15  ;;  %v1607_v37 = vsel %vm1599_vm1, %v1586_v58, %v3658_v10  ;;  %v1613_v59 = vsel %vm1601_vm7, %v3607_v1, %v1612_v35 }
 0x215   : > { %v1609_v42 = vsel %vm1601_vm7, %v1592_v3, %v1608_v9  ;;  %v1298_v27 = vsel %vm1292_vm10, %v3613_v4, 920167782  ;;  %v4510_v11 = vor.u32 %v3570_v16, %v3560_v2  ;;  %vm1507_vm8 = vc.u32 %v3661_v40, %v3656_v41 }
 0x216   : > { %v1610_v9 = vsel %vm1600_vm6, %v1607_v37, %v1609_v42  ;;  %vm1290_vm4 = vcmp.lt.s32.totalorder %v3535_v0, 2  ;;  %v1505_v1 = vmul.u32 %v3611_v14, %v3628_v48  ;;  %v1508_v35 = vadd.s32 1, %v1504_v49 }
 0x217   : > { %v1302_v62 = vsel %vm1292_vm10, %v4510_v11, 1326507024  ;;  %v1611_v39 = vsel %vm1599_vm1, %v3658_v10, %v1592_v3  ;;  %v1616_v2 = vand.u32 65535, %v3665_v47  ;;  %v1617_v45 = vshrl.u32 %v3665_v47, 16 }
 0x218   : > { %v1614_v16 = vsel %vm1600_vm6, %v1611_v39, %v1613_v59  ;;  %v1640_v55 = vand.u32 65535, %v1610_v9  ;;  %v1641_v60 = vshrl.u32 %v1610_v9, 16  ;;  %v1301_v31 = vsel %vm1289_vm9, %v3581_v13, %v3583_v43 }
 0x219   : > { %v1509_v14 = vsel %vm1507_vm8, %v1508_v35, %v1504_v49  ;;  %v1618_v48 = vand.u32 65535, %v1614_v16  ;;  %v1619_v8 = vshrl.u32 %v1614_v16, 16  ;;  %v1299_v21 = vsel %vm1291_vm0, %v3583_v43, %v1298_v27 }
 0x21a   : > { %v1510_v24 = vadd.s32 %v1509_v14, %v1505_v1  ;;  %v1643_v18 = vmul.u32 %v1641_v60, %v1616_v2  ;;  %v1644_v20 = vmul.u32 %v1640_v55, %v1617_v45  ;;  %v1303_v15 = vsel %vm1291_vm0, %v3613_v4, %v1302_v62 }
 0x21b   : > { %v1583_v51 = vshrl.u32 %v4508_v33, %v3586_v63  ;;  %v1621_v37 = vmul.u32 %v1619_v8, %v1616_v2  ;;  %v1622_v42 = vmul.u32 %v1618_v48, %v1617_v45  ;;  %v4511_v49 = vshll.u32 %v3499_v23, 16 }
 0x21c   : > { %v1511_v27 = vadd.s32 536870912, %v1510_v24  ;;  %v1604_v11 = vsel %vm1602_vm3, %v1592_v3, 2102212464  ;;  %v1642_v9 = vmul.u32 %v1640_v55, %v1616_v2  ;;  %v1646_v1 = vshll.u32 %v1643_v18, 16 }
 0x21d   : > { %vm3712_vm5 = vc.u32 %v3521_v46, %v4511_v49  ;;  %v1620_v35 = vmul.u32 %v1618_v48, %v1616_v2  ;;  %v1623_v4 = vmul.u32 %v1619_v8, %v1617_v45  ;;  %v1624_v62 = vshll.u32 %v1621_v37, 16 }
 0x21e   : > { %v1645_v39 = vmul.u32 %v1641_v60, %v1617_v45  ;;  %v3718_v63 = vshrl.u32 %v1511_v27, 30  ;;  %v1626_v16 = vshll.u32 %v1622_v42, 16  ;;  %v1648_v14 = vshll.u32 %v1644_v20, 16 }
 0x21f   : > { %vm1650_vm11 = vc.u32 %v1642_v9, %v1646_v1  ;;  %vm1628_vm12 = vc.u32 %v1620_v35, %v1624_v62  ;;  %v1630_v49 = vadd.s32 %v1624_v62, %v1620_v35  ;;  %v4514_v36 = vmov 0  }
 0x220   : > { %v1651_v30 = vsel %vm1650_vm11, 1, %v4514_v36  ;;  %v1652_v7 = vadd.s32 %v1646_v1, %v1642_v9  ;;  %v3723_v6 = vsel %vm1290_vm4, %v1301_v31, %v1303_v15  ;;  %v1513_v3 = vshll.u32 %v3718_v63, 30 }
 0x221   : > { %v1629_v2 = vsel %vm1628_vm12, 1, %v4514_v36  ;;  %v1653_v55 = vadd.s32 %v1651_v30, %v1645_v39  ;;  %v1603_v45 = vsel %vm1599_vm1, %v1583_v51, %v1586_v58  ;;  %vm1632_vm3 = vc.u32 %v1630_v49, %v1626_v16 }
 0x222   : > { %v1631_v60 = vadd.s32 %v1629_v2, %v1623_v4  ;;  %vm1654_vm2 = vc.u32 %v1652_v7, %v1648_v14  ;;  %v1514_v48 = vsub.s32 %v1510_v24, %v1513_v3  ;;  %v1605_v8 = vsel %vm1601_vm7, %v3658_v10, %v1604_v11 }
 0x223   : > { %v1633_v27 = vsel %vm1632_vm3, 1, %v4514_v36  ;;  %v1655_v31 = vsel %vm1654_vm2, 1, %v4514_v36  ;;  %v1625_v15 = vshrl.u32 %v1621_v37, 16  ;;  %v1647_v1 = vshrl.u32 %v1643_v18, 16 }
 0x224   : > { %v1635_v9 = vadd.s32 %v1633_v27, %v1631_v60  ;;  %v1657_v35 = vadd.s32 %v1655_v31, %v1653_v55  ;;  %v1309_v30 = vshrl.u32 %v3723_v6, 16  ;;  %vm1515_vm15 = vcmp.lt.s32.totalorder %v1514_v48, 0 }
 0x225   : > { %v1516_v58 = vsub.s32 0, %v1514_v48  ;;  %v1627_v51 = vshrl.u32 %v1622_v42, 16  ;;  %v1649_v62 = vshrl.u32 %v1644_v20, 16  ;;  %v4515_v39 = vand.u32 65535, %v3456_v22 }
 0x226   : > { %v1636_v4 = vadd.s32 %v1635_v9, %v1625_v15  ;;  %v1658_v24 = vadd.s32 %v1657_v35, %v1647_v1  ;;  %v4516_v11 = vshll.u32 %v3499_v23, 16  ;;  %v1606_v18 = vsel %vm1600_vm6, %v1603_v45, %v1605_v8 }
 0x227   : > { %v1157_v10 = vmul.u32 %v4515_v39, %v3496_v19  ;;  %v1517_v37 = vsel %vm1515_vm15, %v1516_v58, %v1514_v48  ;;  %v3743_v49 = vadd.s32 %v1652_v7, %v1648_v14  ;;  %v1164_v20 = vsel %vm3712_vm5, 1, %v4514_v36 }
 0x228   : > { %v1165_v16 = vadd.s32 %v4516_v11, %v3521_v46  ;;  %v1518_v3 = vclz %v1517_v37  ;;  %v3745_v2 = vadd.s32 %v1636_v4, %v1627_v51  ;;  %v1659_v42 = vadd.s32 %v1658_v24, %v1649_v62 }
 0x229   : > { %v3753_v22 = vsel %vm1290_vm4, %v3623_v56, %v1299_v21  ;;  %v1308_v46 = vand.u32 65535, %v3723_v6  ;;  %v3759_v7 = vmul.u32 %v1309_v30, %v3538_v17  ;;  %v1161_v61 = vshll.u32 %v1157_v10, 16 }
 0x22a   : > { %v2547_v14 = vadd.s32 4294967294, %v1518_v3  ;;  %v1660_v55 = vmul.u32 %v3665_v47, %v1606_v18  ;;  %vm1662_vm14 = vc.u32 %v3745_v2, %v3743_v49  ;;  %v1663_v59 = vadd.s32 1, %v1659_v42 }
 0x22b   : > { %v1166_v45 = vadd.s32 %v1164_v20, %v3526_v50  ;;  %vm1167_vm1 = vc.u32 %v1165_v16, %v1161_v61  ;;  %v4517_v56 = vand.u32 65535, %v3477_v44  ;;  %v1181_v60 = vshll.u32 %v3530_v29, 16 }
 0x22c   : > { %v1506_v8 = vadd.s32 %v3656_v41, %v3661_v40  ;;  %vm2548_vm6 = vcmp.lt.s32.totalorder %v2547_v14, 0  ;;  %v1664_v27 = vsel %vm1662_vm14, %v1663_v59, %v1659_v42  ;;  %v1168_v47 = vsel %vm1167_vm1, 1, %v4514_v36 }
 0x22d   : > { %v1179_v21 = vmul.u32 %v4517_v56, %v3496_v19  ;;  %v1521_v31 = vsel %vm2548_vm6, 0, %v2547_v14  ;;  %v1665_v15 = vadd.s32 %v1664_v27, %v1660_v55  ;;  %v1170_v9 = vadd.s32 %v1168_v47, %v1166_v45 }
 0x22e   : > { %v4518_v50 = vmov %v4517_v56  ;;  %v1522_v35 = vsub.s32 32, %v1521_v31  ;;  %v1526_v58 = vsub.s32 4294967266, %v1521_v31  ;;  %v1160_v19 = vshrl.u32 %v3499_v23, 16 }
 0x22f   : > { %v1177_v1 = vmul.u32 %v4518_v50, %v3484_v57  ;;  %v1183_v51 = vshll.u32 %v1179_v21, 16  ;;  %v1523_v4 = vshll.u32 %v1514_v48, %v1521_v31  ;;  %v1666_v62 = vadd.s32 536870912, %v1665_v15 }
 0x230   : > { %v1524_v40 = vshrl.u32 %v1506_v8, %v1522_v35  ;;  %v1527_v24 = vadd.s32 127, %v1526_v58  ;;  %v1171_v39 = vadd.s32 %v1170_v9, %v1160_v19  ;;  %v1314_v16 = vshll.u32 %v3759_v7, 16 }
 0x231   : > { %vm1185_vm7 = vc.u32 %v1177_v1, %v1181_v60  ;;  %v1187_v41 = vadd.s32 %v1181_v60, %v1177_v1  ;;  %v3778_v37 = vshrl.u32 %v1666_v62, 30  ;;  %v1162_v23 = vshrl.u32 %v1157_v10, 16 }
 0x232   : > { %v1186_v11 = vsel %vm1185_vm7, 1, %v4514_v36  ;;  %v1525_v57 = vor.u32 %v1524_v40, %v1523_v4  ;;  %v1528_v18 = vshll.u32 %v1527_v24, 23  ;;  %v1307_v3 = vshrl.u32 %v3506_v38, 16 }
 0x233   : > { %v1188_v44 = vadd.s32 %v1186_v11, %v3533_v52  ;;  %vm1189_vm8 = vc.u32 %v1187_v41, %v1183_v51  ;;  %vm1414_vm5 = vcmp.lt.s32.totalorder %v3418_v28, 0  ;;  %v1668_v42 = vshll.u32 %v3778_v37, 30 }
 0x234   : > { %v1190_v48 = vsel %vm1189_vm8, 1, %v4514_v36  ;;  %v1182_v20 = vshrl.u32 %v3530_v29, 16  ;;  %v1310_v14 = vmul.u32 %v1308_v46, %v3538_v17  ;;  %v1331_v55 = vshrl.u32 %v3753_v22, 16 }
 0x235   : > { %v1192_v61 = vadd.s32 %v1190_v48, %v1188_v44  ;;  %v1529_v52 = vor.u32 4788187, %v1528_v18  ;;  %v3788_v59 = vadd.s32 %v1171_v39, %v1162_v23  ;;  %v3790_v45 = vsub.s32 %v1665_v15, %v1668_v42 }
 0x236   : > { %v1184_v10 = vshrl.u32 %v1179_v21, 16  ;;  %v3792_v60 = vmul.u32 %v1308_v46, %v1307_v3  ;;  %vm1318_vm11 = vc.u32 %v1310_v14, %v1314_v16  ;;  %v1532_v27 = vcvt.s32.f32 %v1525_v57 }
 0x237   : > { %v1193_v56 = vadd.s32 %v1192_v61, %v1182_v20  ;;  %v1530_v8 = vand.u32 2147483647, %v1529_v52  ;;  %v3794_v47 = vadd.s32 %v1187_v41, %v1183_v51  ;;  %v1320_v29 = vadd.s32 %v1314_v16, %v1310_v14 }
 0x238   : > { %vm1670_vm12 = vcmp.lt.s32.totalorder %v3790_v45, 0  ;;  %v1671_v31 = vsub.s32 0, %v3790_v45  ;;  %v1330_v50 = vand.u32 65535, %v3753_v22  ;;  %v3800_v15 = vmul.u32 %v1331_v55, %v3538_v17 }
 0x239   : > { %v1194_v9 = vadd.s32 %v1193_v56, %v1184_v10  ;;  %v1533_v21 = vmul.f32 %v1532_v27, %v1530_v8  ;;  %vm1197_vm3 = vc.u32 %v3788_v59, %v3794_v47  ;;  %v1316_v35 = vshll.u32 %v3792_v60, 16 }
 0x23a   : > { %v1672_v46 = vsel %vm1670_vm12, %v1671_v31, %v3790_v45  ;;  %v1319_v58 = vsel %vm1318_vm11, 1, %v4514_v36  ;;  %v1195_v19 = vmul.u32 %v3466_v32, %v3514_v34  ;;  %v1313_v22 = vmul.u32 %v1309_v30, %v1307_v3 }
 0x23b   : > { %v1198_v1 = vadd.s32 1, %v1194_v9  ;;  %v1534_v51 = vxor.u32 2147483648, %v1533_v21  ;;  %v1673_v4 = vclz %v1672_v46  ;;  %v1273_v62 = vshrl.u32 %v4508_v33, %v3523_v12 }
 0x23c   : > { %v4519_v41 = vand.u32 2147483647, %v3418_v28  ;;  %vm1322_vm15 = vc.u32 %v1320_v29, %v1316_v35  ;;  %v1321_v6 = vadd.s32 %v1319_v58, %v1313_v22  ;;  %v1332_v12 = vmul.u32 %v1330_v50, %v3538_v17 }
 0x23d   : > { %v1199_v24 = vsel %vm1197_vm3, %v1198_v1, %v1194_v9  ;;  %v1535_v39 = vsel %vm1414_vm5, %v1534_v51, %v1533_v21  ;;  %v2550_v32 = vadd.s32 4294967294, %v1673_v4  ;;  %v1334_v11 = vmul.u32 %v1330_v50, %v1307_v3 }
 0x23e   : > { %vm3815_vm2 = vcmp.le.f32.partialorder %v4519_v41, 0.7853982  ;;  %v1200_v34 = vadd.s32 %v1199_v24, %v1195_v19  ;;  %v1336_v16 = vshll.u32 %v3800_v15, 16  ;;  %v1323_v18 = vsel %vm1322_vm15, 1, %v4514_v36 }
 0x23f   : > { %v3824_v30 = vsel %vm3815_vm2, %v3418_v28, %v1535_v39  ;;  %vm2551_vm14 = vcmp.lt.s32.totalorder %v2550_v32, 0  ;;  %v1293_v23 = vsel %vm1289_vm9, %v1273_v62, %v3574_v5  ;;  %v1294_v48 = vsel %vm1292_vm10, %v3583_v43, 2102212464 }
 0x240   : > { %v3830_v44 = vmul.f32 %v3824_v30, %v3824_v30  ;;  %v1201_v57 = vadd.s32 536870912, %v1200_v34  ;;  %v1676_v17 = vsel %vm2551_vm14, 0, %v2550_v32  ;;  %vm1340_vm1 = vc.u32 %v1332_v12, %v1336_v16 }
 0x241   : > { %v1335_v42 = vmul.u32 %v1331_v55, %v1307_v3  ;;  %v1661_v61 = vadd.s32 %v3743_v49, %v3745_v2  ;;  %v1677_v14 = vsub.s32 32, %v1676_v17  ;;  %v1681_v52 = vsub.s32 4294967266, %v1676_v17 }
 0x242   : > { %v1548_v20 = vmul.f32 -0.00019511016, %v3830_v44  ;;  %v3842_v10 = vshrl.u32 %v1201_v57, 30  ;;  %v1325_v56 = vadd.s32 %v1323_v18, %v1321_v6  ;;  %v1341_v8 = vsel %vm1340_vm1, 1, %v4514_v36 }
 0x243   : > { %v1679_v27 = vshrl.u32 %v1661_v61, %v1677_v14  ;;  %v1338_v29 = vshll.u32 %v1334_v11, 16  ;;  %v1342_v31 = vadd.s32 %v1336_v16, %v1332_v12  ;;  %v1295_v43 = vsel %vm1291_vm0, %v3581_v13, %v1294_v48 }
 0x244   : > { %v1549_v5 = vadd.f32 0.008332121, %v1548_v20  ;;  %v1678_v3 = vshll.u32 %v3790_v45, %v1676_v17  ;;  %v1682_v55 = vadd.s32 127, %v1681_v52  ;;  %v1203_v49 = vshll.u32 %v3842_v10, 30 }
 0x245   : > { %v1541_v2 = vmul.f32 -0.001358992, %v3830_v44  ;;  %v1315_v9 = vshrl.u32 %v3759_v7, 16  ;;  %v1343_v50 = vadd.s32 %v1341_v8, %v1335_v42  ;;  %vm1344_vm9 = vc.u32 %v1342_v31, %v1338_v29 }
 0x246   : > { %v1680_v21 = vor.u32 %v1679_v27, %v1678_v3  ;;  %v1683_v46 = vshll.u32 %v1682_v55, 23  ;;  %v1204_v1 = vsub.s32 %v1200_v34, %v1203_v49  ;;  %v1345_v35 = vsel %vm1344_vm9, 1, %v4514_v36 }
 0x247   : > { %v1296_v58 = vsel %vm1290_vm4, %v1293_v23, %v1295_v43  ;;  %v1550_v13 = vmul.f32 %v1549_v5, %v3830_v44  ;;  %v1326_v45 = vadd.s32 %v1325_v56, %v1315_v9  ;;  %v1536_v19 = vsub.s32 4, %v3718_v63 }
 0x248   : > { %v1684_v22 = vor.u32 4788187, %v1683_v46  ;;  %vm1205_vm10 = vcmp.lt.s32.totalorder %v1204_v1, 0  ;;  %v1206_v51 = vsub.s32 0, %v1204_v1  ;;  %v1542_v4 = vadd.f32 0.041655596, %v1541_v2 }
 0x249   : > { %v1317_v7 = vshrl.u32 %v3792_v60, 16  ;;  %v1337_v62 = vshrl.u32 %v3800_v15, 16  ;;  %v1347_v41 = vadd.s32 %v1345_v35, %v1343_v50  ;;  %v1687_v39 = vcvt.s32.f32 %v1680_v21 }
 0x24a   : > { %v1685_v24 = vand.u32 2147483647, %v1684_v22  ;;  %v1207_v32 = vsel %vm1205_vm10, %v1206_v51, %v1204_v1  ;;  %v1339_v34 = vshrl.u32 %v1334_v11, 16  ;;  %v1551_v0 = vadd.f32 -0.16666654, %v1550_v13 }
 0x24b   : > { %v1208_v6 = vclz %v1207_v32  ;;  %v3859_v12 = vadd.s32 %v1326_v45, %v1317_v7  ;;  %v1348_v16 = vadd.s32 %v1347_v41, %v1337_v62  ;;  %v1543_v18 = vmul.f32 %v1542_v4, %v3830_v44 }
 0x24c   : > { %v1688_v57 = vmul.f32 %v1687_v39, %v1685_v24  ;;  %v3862_v48 = vadd.s32 %v1342_v31, %v1338_v29  ;;  %v1350_v60 = vmul.u32 %v3506_v38, %v1296_v58  ;;  %v1537_v15 = vsel %vm1414_vm5, %v1536_v19, %v3718_v63 }
 0x24d   : > { %v2541_v23 = vadd.s32 4294967294, %v1208_v6  ;;  %v1349_v17 = vadd.s32 %v1348_v16, %v1339_v34  ;;  %vm1569_vm0 = vcmp.lt.s32.totalorder %v3460_v26, 0  ;;  %v1552_v42 = vmul.f32 %v1551_v0, %v3830_v44 }
 0x24e   : > { %v1689_v11 = vxor.u32 2147483648, %v1688_v57  ;;  %vm1352_vm6 = vc.u32 %v3859_v12, %v3862_v48  ;;  %v4522_v61 = vand.u32 2147483647, %v3460_v26  ;;  %v1691_v63 = vsub.s32 4, %v3778_v37 }
 0x24f   : > { %vm2542_vm4 = vcmp.lt.s32.totalorder %v2541_v23, 0  ;;  %v1353_v20 = vadd.s32 1, %v1349_v17  ;;  %v1544_v56 = vadd.f32 -0.4999988, %v1543_v18  ;;  %v1196_v5 = vadd.s32 %v3794_v47, %v3788_v59 }
 0x250   : > { %vm3874_vm7 = vcmp.le.f32.partialorder %v4522_v61, 0.7853982  ;;  %v1690_v38 = vsel %vm1569_vm0, %v1689_v11, %v1688_v57  ;;  %v1211_v52 = vsel %vm2542_vm4, 0, %v2541_v23  ;;  %v1539_v29 = vsel %vm3815_vm2, 0, %v1537_v15 }
 0x251   : > { %v1693_v8 = vsel %vm3874_vm7, %v3460_v26, %v1690_v38  ;;  %v1212_v27 = vsub.s32 32, %v1211_v52  ;;  %v1216_v43 = vsub.s32 4294967266, %v1211_v52  ;;  %v1354_v3 = vsel %vm1352_vm6, %v1353_v20, %v1349_v17 }
 0x252   : > { %v1695_v31 = vmul.f32 %v1693_v8, %v1693_v8  ;;  %v1553_v55 = vadd.f32 1.0, %v1552_v42  ;;  %v1355_v2 = vadd.s32 %v1354_v3, %v1350_v60  ;;  %v1213_v21 = vshll.u32 %v1204_v1, %v1211_v52 }
 0x253   : > { %v1214_v49 = vshrl.u32 %v1196_v5, %v1212_v27  ;;  %v1217_v46 = vadd.s32 127, %v1216_v43  ;;  %v1545_v35 = vmul.f32 %v1544_v56, %v3830_v44  ;;  %v1556_v58 = vadd.s32 3, %v1539_v29 }
 0x254   : > { %v1696_v9 = vmul.f32 -0.001358992, %v1695_v31  ;;  %v1703_v50 = vmul.f32 -0.00019511016, %v1695_v31  ;;  %v1692_v59 = vsel %vm1569_vm0, %v1691_v63, %v3778_v37  ;;  %v1356_v47 = vadd.s32 536870912, %v1355_v2 }
 0x255   : > { %v1215_v45 = vor.u32 %v1214_v49, %v1213_v21  ;;  %v1218_v19 = vshll.u32 %v1217_v46, 23  ;;  %v1554_v22 = vmul.f32 %v1553_v55, %v3824_v30  ;;  %v1694_v1 = vsel %vm3874_vm7, 0, %v1692_v59 }
 0x256   : > { %v1697_v40 = vadd.f32 0.041655596, %v1696_v9  ;;  %v1704_v13 = vadd.f32 0.008332121, %v1703_v50  ;;  %v3893_v51 = vshrl.u32 %v1356_v47, 30  ;;  %v1546_v62 = vadd.f32 1.0, %v1545_v35 }
 0x257   : > { %v1219_v44 = vor.u32 4788187, %v1218_v19  ;;  %v1557_v41 = vand.u32 3, %v1556_v58  ;;  %v1222_v34 = vcvt.s32.f32 %v1215_v45  ;;  %v1560_v0 = vxor.u32 2147483648, %v1554_v22 }
 0x258   : > { %v1698_v4 = vmul.f32 %v1697_v40, %v1695_v31  ;;  %v1705_v7 = vmul.f32 %v1704_v13, %v1695_v31  ;;  %v1358_v24 = vshll.u32 %v3893_v51, 30  ;;  %v1711_v6 = vadd.s32 3, %v1694_v1 }
 0x259   : > { %v1220_v32 = vand.u32 2147483647, %v1219_v44  ;;  %vm1104_vm8 = vcmp.lt.s32.totalorder %v3415_v25, 0  ;;  %vm1559_vm5 = vcmp.eq.s32.totalorder %v1557_v41, 0  ;;  %v1563_v17 = vxor.u32 2147483648, %v1546_v62 }
 0x25a   : > { %v1699_v37 = vadd.f32 -0.4999988, %v1698_v4  ;;  %v1706_v39 = vadd.f32 -0.16666654, %v1705_v7  ;;  %v1359_v16 = vsub.s32 %v1355_v2, %v1358_v24  ;;  %v1561_v42 = vsel %vm1559_vm5, %v1546_v62, %v1560_v0 }
 0x25b   : > { %v1223_v18 = vmul.f32 %v1222_v34, %v1220_v32  ;;  %v1712_v20 = vand.u32 3, %v1711_v6  ;;  %v4525_v61 = vand.u32 2147483647, %v3415_v25  ;;  %vm1558_vm3 = vcmp.lt.s32.totalorder %v1557_v41, 2 }
 0x25c   : > { %v1700_v30 = vmul.f32 %v1699_v37, %v1695_v31  ;;  %v1707_v57 = vmul.f32 %v1706_v39, %v1695_v31  ;;  %vm1360_vm11 = vcmp.lt.s32.totalorder %v1359_v16, 0  ;;  %v1361_v23 = vsub.s32 0, %v1359_v16 }
 0x25d   : > { %v1224_v11 = vxor.u32 2147483648, %v1223_v18  ;;  %vm3901_vm12 = vcmp.le.f32.partialorder %v4525_v61, 0.7853982  ;;  %vm1562_vm2 = vcmp.eq.s32.totalorder %v1557_v41, 2  ;;  %vm1555_vm15 = vweird.f32 %v3418_v28 }
 0x25e   : > { %v1701_v60 = vadd.f32 1.0, %v1700_v30  ;;  %v1708_v15 = vadd.f32 1.0, %v1707_v57  ;;  %v1362_v38 = vsel %vm1360_vm11, %v1361_v23, %v1359_v16  ;;  %v1564_v29 = vsel %vm1562_vm2, %v1563_v17, %v1554_v22 }
 0x25f   : > { %v1225_v56 = vsel %vm1104_vm8, %v1224_v11, %v1223_v18  ;;  %v1363_v5 = vclz %v1362_v38  ;;  %v1565_v55 = vsel %vm1558_vm3, %v1561_v42, %v1564_v29  ;;  %vm1714_vm14 = vcmp.eq.s32.totalorder %v1712_v20, 0 }
 0x260   : > { %v1709_v63 = vmul.f32 %v1708_v15, %v1693_v8  ;;  %v1718_v52 = vxor.u32 2147483648, %v1701_v60  ;;  %v1228_v27 = vsel %vm3901_vm12, %v3415_v25, %v1225_v56  ;;  %vm1717_vm1 = vcmp.eq.s32.totalorder %v1712_v20, 2 }
 0x261   : > { %v1230_v43 = vmul.f32 %v1228_v27, %v1228_v27  ;;  %v2544_v3 = vadd.s32 4294967294, %v1363_v5  ;;  %vm1713_vm9 = vcmp.lt.s32.totalorder %v1712_v20, 2  ;;  %vm1710_vm0 = vweird.f32 %v3460_v26 }
 0x262   : > { %v1715_v31 = vxor.u32 2147483648, %v1709_v63  ;;  %v1719_v49 = vsel %vm1717_vm1, %v1718_v52, %v1709_v63  ;;  %v1566_v21 = vsel %vm1555_vm15, nan, %v1565_v55  ;;  %v1351_v35 = vadd.s32 %v3862_v48, %v3859_v12 }
 0x263   : > { %vm2545_vm10 = vcmp.lt.s32.totalorder %v2544_v3, 0  ;;  %v1238_v9 = vmul.f32 -0.00019511016, %v1230_v43  ;;  %v1231_v19 = vmul.f32 -0.001358992, %v1230_v43  ;;  %v1226_v12 = vsub.s32 4, %v3842_v10 }
 0x264   : > { %v1716_v8 = vsel %vm1714_vm14, %v1701_v60, %v1715_v31  ;;  %v1366_v50 = vsel %vm2545_vm10, 0, %v2544_v3  ;;  %vm1259_vm4 = vcmp.lt.s32.totalorder %v3421_v54, 0  ;;  %v4528_v32 = vand.u32 2147483647, %v3421_v54 }
 0x265   : > { %v1720_v2 = vsel %vm1713_vm9, %v1716_v8, %v1719_v49  ;;  %v1367_v58 = vsub.s32 32, %v1366_v50  ;;  %v1371_v28 = vsub.s32 4294967266, %v1366_v50  ;;  %v1239_v40 = vadd.f32 0.008332121, %v1238_v9 }
 0x266   : > { %v1721_v46 = vsel %vm1710_vm0, nan, %v1720_v2  ;;  %v1368_v13 = vshll.u32 %v1359_v16, %v1366_v50  ;;  %v1232_v7 = vadd.f32 0.041655596, %v1231_v19  ;;  %vm3918_vm6 = vcmp.le.f32.partialorder %v4528_v32, 0.7853982  ;;  %v2581_v19 = vld [vmem:[%s4454_s5] sm:$0xff] }
 0x267   : > { %v1727_v59 = vpack.c.bf16 %v1721_v46, %v1566_v21  ;;  %v1369_v47 = vshrl.u32 %v1351_v35, %v1367_v58  ;;  %v1372_v45 = vadd.s32 127, %v1371_v28  ;;  %v1240_v26 = vmul.f32 %v1239_v40, %v1230_v43 }
 0x268   : > { %v1233_v48 = vmul.f32 %v1232_v7, %v1230_v43  ;;  %v1227_v6 = vsel %vm1104_vm8, %v1226_v12, %v3842_v10  ;;  %v1381_v16 = vsub.s32 4, %v3893_v51  ;;  %vm1245_vm2 = vweird.f32 %v3415_v25  ;;  %v1745_v25 = vpop.permute.xlu0 %1744 }
 0x269   : > { %1774 = vmatpush.bf16.msra.mxu1 %v1727_v59  ;;  %v1370_v22 = vor.u32 %v1369_v47, %v1368_v13  ;;  %v1373_v1 = vshll.u32 %v1372_v45, 23  ;;  %v1241_v41 = vadd.f32 -0.16666654, %v1240_v26  ;;  %v1229_v23 = vsel %vm3901_vm12, 0, %v1227_v6 }
 0x26a   : > { %v1234_v57 = vadd.f32 -0.4999988, %v1233_v48  ;;  %v1382_v11 = vsel %vm1259_vm4, %v1381_v16, %v3893_v51  ;;  %v1246_v10 = vadd.s32 3, %v1229_v23  ;;  %vm1400_vm15 = vweird.f32 %v3421_v54 }
 0x26b   : > { %v1374_v4 = vor.u32 4788187, %v1373_v1  ;;  %v1377_v62 = vcvt.s32.f32 %v1370_v22  ;;  %v1242_v39 = vmul.f32 %v1241_v41, %v1230_v43  ;;  %v1384_v63 = vsel %vm3918_vm6, 0, %v1382_v11  ;;  %v2582_v22 = vld [vmem:[%s4454_s5 + $0x8] sm:$0xff]  ;;  %v1735_v1 = vpop.permute.xlu2 %1734 }
 0x26c   : > { %v1235_v42 = vmul.f32 %v1234_v57, %v1230_v43  ;;  %v1247_v14 = vand.u32 3, %v1246_v10  ;;  %v1401_v3 = vadd.s32 3, %v1384_v63  ;;  %v4531_v6 = vmov 1326507024  }
 0x26d   : > { %v1375_v44 = vand.u32 2147483647, %v1374_v4  ;;  %v1243_v17 = vadd.f32 1.0, %v1242_v39 }
 0x26e   : > { %v1236_v5 = vadd.f32 1.0, %v1235_v42  ;;  %vm1249_vm7 = vcmp.eq.s32.totalorder %v1247_v14, 0  ;;  %v1402_v9 = vand.u32 3, %v1401_v3  ;;  %vm1252_vm8 = vcmp.eq.s32.totalorder %v1247_v14, 2 }
 0x26f   : > { %v1378_v24 = vmul.f32 %v1377_v62, %v1375_v44  ;;  %v1244_v38 = vmul.f32 %v1243_v17, %v1228_v27  ;;  %vm1248_vm5 = vcmp.lt.s32.totalorder %v1247_v14, 2  ;;  %v4532_v17 = vmov 2131351028  }
 0x270   : > { %v1253_v2 = vxor.u32 2147483648, %v1236_v5  ;;  %vm1404_vm11 = vcmp.eq.s32.totalorder %v1402_v9, 0  ;;  %vm1407_vm12 = vcmp.eq.s32.totalorder %v1402_v9, 2  ;;  %vm1403_vm3 = vcmp.lt.s32.totalorder %v1402_v9, 2  ;;  %v1740_v62 = vpop.permute.xlu0 %1739 }
 0x271   : > { %v1379_v37 = vxor.u32 2147483648, %v1378_v24  ;;  %v1250_v55 = vxor.u32 2147483648, %v1244_v38 }
 0x272   : > { %v1254_v46 = vsel %vm1252_vm8, %v1253_v2, %v1244_v38 }
 0x273   : > { %v1380_v0 = vsel %vm1259_vm4, %v1379_v37, %v1378_v24  ;;  %v1251_v50 = vsel %vm1249_vm7, %v1236_v5, %v1250_v55 }
 0x274   : > { %v1383_v30 = vsel %vm3918_vm6, %v3421_v54, %v1380_v0  ;;  %v1255_v58 = vsel %vm1248_vm5, %v1251_v50, %v1254_v46 }
 0x275   : > { %v1385_v18 = vmul.f32 %v1383_v30, %v1383_v30  ;;  %v1256_v40 = vsel %vm1245_vm2, nan, %v1255_v58 }
 0x277   : > { %v1386_v60 = vmul.f32 -0.001358992, %v1385_v18  ;;  %v1393_v15 = vmul.f32 -0.00019511016, %v1385_v18 }
 0x279   : > { %v1387_v20 = vadd.f32 0.041655596, %v1386_v60  ;;  %v1394_v61 = vadd.f32 0.008332121, %v1393_v15  ;;  %v4533_v15 = vmov 2102212464  }
 0x27b   : > { %v1388_v52 = vmul.f32 %v1387_v20, %v1385_v18  ;;  %v1395_v56 = vmul.f32 %v1394_v61, %v1385_v18  ;;  %v4534_v61 = vmov 2475754826  }
 0x27d   : > { %v1389_v29 = vadd.f32 -0.4999988, %v1388_v52  ;;  %v1396_v31 = vadd.f32 -0.16666654, %v1395_v56 }
 0x27f   : > { %v1390_v8 = vmul.f32 %v1389_v29, %v1385_v18  ;;  %v1397_v49 = vmul.f32 %v1396_v31, %v1385_v18 }
 0x281   : > { %v1391_v51 = vadd.f32 1.0, %v1390_v8  ;;  %v1398_v43 = vadd.f32 1.0, %v1397_v49 }
 0x283   : > { %v1399_v27 = vmul.f32 %v1398_v43, %v1383_v30  ;;  %v1408_v21 = vxor.u32 2147483648, %v1391_v51 }
 0x285   : > { %v1405_v35 = vxor.u32 2147483648, %v1399_v27  ;;  %v1409_v28 = vsel %vm1407_vm12, %v1408_v21, %v1399_v27 }
 0x287   : > { %v1406_v59 = vsel %vm1404_vm11, %v1391_v51, %v1405_v35 }
 0x288   : > { %v1410_v47 = vsel %vm1403_vm3, %v1406_v59, %v1409_v28 }
 0x289   : > { %v1411_v13 = vsel %vm1400_vm15, nan, %v1410_v47 }
 0x28a   : > { %v1726_v45 = vpack.c.bf16 %v1411_v13, %v1256_v40 }
 0x28c   : > { %1775 = vmatpush.bf16.msra.mxu1 %v1726_v45 }
 0x28f   : > { %2560 = vmatmul.msk.bf16.vlgmr.msra.gmra.mxu1 %vm1076_vm13, %v2581_v19 }
 0x29f   : > { %2561 = vmatmul.msk.bf16.gmra.mxu1 %vm1076_vm13, %v2582_v22 }
 0x30c   : > { %v1777_v54 = vpop.f32.mrf.mxu1 }
 0x30d   : > { %v3944_v26 = vadd.f32 %v1777_v54, %v1735_v1 }
 0x30f   : > { %v1790_v4 = vand.u32 2139095040, %v3944_v26  ;;  %v4487_v30 = vand.u32 2147483647, %v3944_v26 }
 0x311   : > { %v1791_v7 = vshrl.u32 %v1790_v4, 23  ;;  %v1794_v3 = vand.u32 8388607, %v4487_v30  ;;  %v1750_v4 = vpop.permute.xlu1 %1749 }
 0x313   : > { %v2562_v44 = vadd.s32 4294967169, %v1791_v7  ;;  %v1795_v50 = vor.u32 8388608, %v1794_v3 }
 0x314   : > { %v1779_v41 = vpop.f32.mrf.mxu1 }
 0x315   : > { %v1797_v24 = vadd.s32 1, %v2562_v44  ;;  %v3947_v12 = vadd.f32 %v1779_v41, %v1740_v62  ;;  %v3974_v1 = vshll.u32 %v1795_v50, 8 }
 0x317   : > { %vm1798_vm14 = vcmp.gt.s32.totalorder %v1797_v24, 0  ;;  %v1945_v37 = vand.u32 2139095040, %v3947_v12  ;;  %v4486_v63 = vand.u32 2147483647, %v3947_v12 }
 0x318   : > { %v1799_v48 = vsel %vm1798_vm14, %v1797_v24, 0 }
 0x319   : > { %v1801_v39 = vand.u32 31, %v1799_v48  ;;  %v1946_v34 = vshrl.u32 %v1945_v37, 23  ;;  %v1800_v23 = vshrl.u32 %v1799_v48, 5  ;;  %v1949_v43 = vand.u32 8388607, %v4486_v63 }
 0x31b   : > { %v1802_v32 = vsub.s32 32, %v1801_v39  ;;  %v1816_v57 = vshll.u32 %v4494_v53, %v1801_v39  ;;  %v2565_v18 = vadd.s32 4294967169, %v1946_v34  ;;  %v1813_v42 = vshll.u32 %v4533_v15, %v1801_v39 }
 0x31c   : > { %v1782_v20 = vpop.f32.mrf.mxu1  ;;  %v1807_v52 = vshll.u32 %v4534_v61, %v1801_v39  ;;  %v1810_v56 = vshll.u32 %v4532_v17, %v1801_v39  ;;  %v1804_v31 = vshll.u32 %v4508_v33, %v1801_v39  ;;  %vm1822_vm1 = vcmp.lt.s32.totalorder %v1800_v23, 4 }
 0x31d   : > { %v1814_v0 = vshrl.u32 %v4494_v53, %v1802_v32  ;;  %v1817_v16 = vshrl.u32 %v4531_v6, %v1802_v32  ;;  %v1808_v60 = vshrl.u32 %v4532_v17, %v1802_v32  ;;  %v1811_v11 = vshrl.u32 %v4533_v15, %v1802_v32 }
 0x31e   : > { %v1805_v10 = vshrl.u32 %v4534_v61, %v1802_v32  ;;  %v1952_v29 = vadd.s32 1, %v2565_v18  ;;  %v3962_v14 = vadd.f32 %v1782_v20, %v1745_v25  ;;  %vm1819_vm10 = vcmp.lt.s32.totalorder %v1800_v23, 1 }
 0x31f   : > { %v1818_v38 = vor.u32 %v1817_v16, %v1816_v57  ;;  %v1815_v5 = vor.u32 %v1814_v0, %v1813_v42  ;;  %v1809_v55 = vor.u32 %v1808_v60, %v1807_v52  ;;  %v1812_v8 = vor.u32 %v1811_v11, %v1810_v56 }
 0x320   : > { %v1806_v49 = vor.u32 %v1805_v10, %v1804_v31  ;;  %vm1953_vm9 = vcmp.gt.s32.totalorder %v1952_v29, 0  ;;  %vm1821_vm0 = vcmp.lt.s32.totalorder %v1800_v23, 3  ;;  %v2100_v9 = vand.u32 2139095040, %v3962_v14 }
 0x321   : > { %v1832_v2 = vsel %vm1822_vm1, %v1818_v38, 1326507024  ;;  %v1828_v51 = vsel %vm1822_vm1, %v1815_v5, 920167782  ;;  %v1824_v27 = vsel %vm1822_vm1, %v1812_v8, 2102212464  ;;  %v1831_v21 = vsel %vm1819_vm10, %v1809_v55, %v1812_v8 }
 0x322   : > { %v1833_v46 = vsel %vm1821_vm0, %v1815_v5, %v1832_v2  ;;  %v1803_v35 = vshrl.u32 %v4508_v33, %v1802_v32  ;;  %v1827_v58 = vsel %vm1819_vm10, %v1806_v49, %v1809_v55  ;;  %v1829_v59 = vsel %vm1821_vm0, %v1812_v8, %v1828_v51 }
 0x323   : > { %v1954_v28 = vsel %vm1953_vm9, %v1952_v29, 0  ;;  %vm1820_vm4 = vcmp.lt.s32.totalorder %v1800_v23, 2  ;;  %v1950_v47 = vor.u32 8388608, %v1949_v43  ;;  %v1825_v13 = vsel %vm1821_vm0, %v1809_v55, %v1824_v27 }
 0x324   : > { %v1823_v40 = vsel %vm1819_vm10, %v1803_v35, %v1806_v49  ;;  %v3970_v45 = vsel %vm1820_vm4, %v1831_v21, %v1833_v46  ;;  %v2101_v19 = vshrl.u32 %v2100_v9, 23  ;;  %v1784_v22 = vpop.f32.mrf.mxu1  ;;  %v3972_v25 = vsel %vm1820_vm4, %v1827_v58, %v1829_v59 }
 0x325   : > { %v1956_v54 = vand.u32 31, %v1954_v28  ;;  %v3976_v7 = vsel %vm1820_vm4, %v1823_v40, %v1825_v13  ;;  %v1839_v44 = vshrl.u32 %v3970_v45, 16  ;;  %v3979_v62 = vshll.u32 %v1950_v47, 8 }
 0x326   : > { %v3981_v41 = vadd.f32 %v1784_v22, %v1750_v4  ;;  %v4489_v24 = vand.u32 65535, %v3970_v45  ;;  %v1861_v48 = vshrl.u32 %v3972_v25, 16  ;;  %v2568_v37 = vadd.s32 4294967169, %v2101_v19 }
 0x327   : > { %v3986_v39 = vand.u32 65535, %v3974_v1  ;;  %v3988_v32 = vsub.s32 32, %v1956_v54  ;;  %v3991_v34 = vshrl.u32 %v3974_v1, 16  ;;  %v4000_v23 = vand.u32 65535, %v3979_v62 }
 0x328   : > { %v2107_v16 = vadd.s32 1, %v2568_v37  ;;  %v2255_v60 = vand.u32 2139095040, %v3981_v41  ;;  %v4488_v56 = vand.u32 2147483647, %v3962_v14  ;;  %v4027_v8 = vshrl.u32 %v1954_v28, 5 }
 0x329   : > { %v3996_v57 = vmul.u32 %v1839_v44, %v3986_v39  ;;  %v4006_v11 = vmul.u32 %v4489_v24, %v3986_v39  ;;  %v4009_v42 = vmul.u32 %v1839_v44, %v3991_v34  ;;  %v4012_v20 = vmul.u32 %v1861_v48, %v3986_v39 }
 0x32a   : > { %vm2108_vm6 = vcmp.gt.s32.totalorder %v2107_v16, 0  ;;  %v4015_v10 = vmul.u32 %v1861_v48, %v3991_v34  ;;  %v1960_v38 = vshrl.u32 %v4534_v61, %v3988_v32  ;;  %v1963_v52 = vshrl.u32 %v4532_v17, %v3988_v32 }
 0x32b   : > { %v1966_v5 = vshrl.u32 %v4533_v15, %v3988_v32  ;;  %v1969_v29 = vshrl.u32 %v4494_v53, %v3988_v32  ;;  %v2109_v31 = vsel %vm2108_vm6, %v2107_v16, 0  ;;  %v2256_v3 = vshrl.u32 %v2255_v60, 23 }
 0x32c   : > { %v1959_v49 = vshll.u32 %v4508_v33, %v1956_v54  ;;  %v1962_v2 = vshll.u32 %v4534_v61, %v1956_v54  ;;  %v1965_v51 = vshll.u32 %v4532_v17, %v1956_v54  ;;  %v1968_v43 = vshll.u32 %v4533_v15, %v1956_v54 }
 0x32d   : > { %v2111_v9 = vand.u32 31, %v2109_v31  ;;  %v2571_v50 = vadd.s32 4294967169, %v2256_v3  ;;  %v4036_v21 = vshll.u32 %v4494_v53, %v1956_v54  ;;  %v4040_v46 = vshrl.u32 %v4531_v6, %v3988_v32 }
 0x32e   : > { %v4033_v27 = vor.u32 %v1960_v38, %v1959_v49  ;;  %v2104_v35 = vand.u32 8388607, %v4488_v56  ;;  %v4044_v58 = vor.u32 %v1963_v52, %v1962_v2  ;;  %v4046_v59 = vor.u32 %v1966_v5, %v1965_v51 }
 0x32f   : > { %v4048_v28 = vor.u32 %v1969_v29, %v1968_v43  ;;  %v2112_v47 = vsub.s32 32, %v2111_v9  ;;  %v2110_v40 = vshrl.u32 %v2109_v31, 5  ;;  %v2123_v13 = vshll.u32 %v4533_v15, %v2111_v9 }
 0x330   : > { %v2126_v19 = vshll.u32 %v4494_v53, %v2111_v9  ;;  %v2262_v22 = vadd.s32 1, %v2571_v50  ;;  %vm1974_vm7 = vcmp.lt.s32.totalorder %v4027_v8, 1  ;;  %v2114_v44 = vshll.u32 %v4508_v33, %v2111_v9 }
 0x331   : > { %v2124_v54 = vshrl.u32 %v4494_v53, %v2112_v47  ;;  %v2127_v4 = vshrl.u32 %v4531_v6, %v2112_v47  ;;  %v2115_v48 = vshrl.u32 %v4534_v61, %v2112_v47  ;;  %v2105_v37 = vor.u32 8388608, %v2104_v35 }
 0x332   : > { %vm2263_vm8 = vcmp.gt.s32.totalorder %v2262_v22, 0  ;;  %v2117_v16 = vshll.u32 %v4534_v61, %v2111_v9  ;;  %v2118_v60 = vshrl.u32 %v4532_v17, %v2112_v47  ;;  %vm2132_vm5 = vcmp.lt.s32.totalorder %v2110_v40, 4 }
 0x333   : > { %v2125_v38 = vor.u32 %v2124_v54, %v2123_v13  ;;  %v2128_v52 = vor.u32 %v2127_v4, %v2126_v19  ;;  %v2264_v5 = vsel %vm2263_vm8, %v2262_v22, 0  ;;  %v2116_v29 = vor.u32 %v2115_v48, %v2114_v44 }
 0x334   : > { %v4059_v31 = vand.u32 31, %v2264_v5  ;;  %v2119_v3 = vor.u32 %v2118_v60, %v2117_v16  ;;  %v2121_v49 = vshrl.u32 %v4533_v15, %v2112_v47  ;;  %v4063_v51 = vshrl.u32 %v2264_v5, 5 }
 0x335   : > { %v2142_v2 = vsel %vm2132_vm5, %v2128_v52, 1326507024  ;;  %v2113_v43 = vshrl.u32 %v4508_v33, %v2112_v47  ;;  %v2120_v50 = vshll.u32 %v4532_v17, %v2111_v9  ;;  %v2138_v35 = vsel %vm2132_vm5, %v2125_v38, 920167782 }
 0x336   : > { %v4069_v13 = vsub.s32 32, %v4059_v31  ;;  %vm2129_vm11 = vcmp.lt.s32.totalorder %v2110_v40, 1  ;;  %vm2130_vm12 = vcmp.lt.s32.totalorder %v2110_v40, 2  ;;  %v2278_v19 = vshll.u32 %v4533_v15, %v4059_v31 }
 0x337   : > { %v2122_v22 = vor.u32 %v2121_v49, %v2120_v50  ;;  %vm2131_vm3 = vcmp.lt.s32.totalorder %v2110_v40, 3  ;;  %v2137_v54 = vsel %vm2129_vm11, %v2116_v29, %v2119_v3  ;;  %v4079_v44 = vshll.u32 %v2105_v37, 8 }
 0x338   : > { %v2279_v4 = vshrl.u32 %v4494_v53, %v4069_v13  ;;  %v2282_v9 = vshrl.u32 %v4531_v6, %v4069_v13  ;;  %v2143_v47 = vsel %vm2131_vm3, %v2125_v38, %v2142_v2  ;;  %v2281_v48 = vshll.u32 %v4494_v53, %v4059_v31 }
 0x339   : > { %v2134_v16 = vsel %vm2132_vm5, %v2122_v22, 2102212464  ;;  %v2139_v60 = vsel %vm2131_vm3, %v2122_v22, %v2138_v35  ;;  %v2141_v52 = vsel %vm2129_vm11, %v2119_v3, %v2122_v22  ;;  %v4092_v6 = vsel %vm1974_vm7, %v4033_v27, %v4044_v58 }
 0x33a   : > { %v4094_v37 = vor.u32 %v2279_v4, %v2278_v19  ;;  %v2140_v38 = vsel %vm2130_vm12, %v2137_v54, %v2139_v60  ;;  %v2283_v53 = vor.u32 %v2282_v9, %v2281_v48  ;;  %v2133_v49 = vsel %vm2129_vm11, %v2113_v43, %v2116_v29 }
 0x33b   : > { %v2135_v2 = vsel %vm2131_vm3, %v2119_v3, %v2134_v16  ;;  %v2144_v50 = vsel %vm2130_vm12, %v2141_v52, %v2143_v47  ;;  %v2146_v35 = vand.u32 65535, %v4079_v44  ;;  %v2147_v22 = vshrl.u32 %v4079_v44, 16 }
 0x33c   : > { %v2148_v63 = vand.u32 65535, %v2144_v50  ;;  %v2149_v30 = vshrl.u32 %v2144_v50, 16  ;;  %vm2287_vm2 = vcmp.lt.s32.totalorder %v4063_v51, 4  ;;  %v2170_v0 = vand.u32 65535, %v2140_v38 }
 0x33d   : > { %v2171_v19 = vshrl.u32 %v2140_v38, 16  ;;  %v2252_v4 = vand.u32 2147483647, %v3981_v41  ;;  %v2293_v29 = vsel %vm2287_vm2, %v4094_v37, 920167782  ;;  %v4108_v3 = vsel %vm2130_vm12, %v2133_v49, %v2135_v2 }
 0x33e   : > { %v2151_v43 = vmul.u32 %v2149_v30, %v2146_v35  ;;  %v2152_v54 = vmul.u32 %v2148_v63, %v2147_v22  ;;  %v2297_v9 = vsel %vm2287_vm2, %v2283_v53, 1326507024  ;;  %v2150_v47 = vmul.u32 %v2148_v63, %v2146_v35 }
 0x33f   : > { %v2173_v48 = vmul.u32 %v2171_v19, %v2146_v35  ;;  %v2174_v16 = vmul.u32 %v2170_v0, %v2147_v22  ;;  %v2153_v60 = vmul.u32 %v2149_v30, %v2147_v22  ;;  %v2172_v38 = vmul.u32 %v2170_v0, %v2146_v35 }
 0x340   : > { %v2154_v52 = vshll.u32 %v2151_v43, 16  ;;  %v2175_v50 = vmul.u32 %v2171_v19, %v2147_v22  ;;  %v2155_v56 = vshrl.u32 %v2151_v43, 16  ;;  %v2156_v18 = vshll.u32 %v2152_v54, 16 }
 0x341   : > { %v2157_v24 = vshrl.u32 %v2152_v54, 16  ;;  %v2176_v55 = vshll.u32 %v2173_v48, 16  ;;  %v2177_v49 = vshrl.u32 %v2173_v48, 16  ;;  %v2259_v2 = vand.u32 8388607, %v2252_v4 }
 0x342   : > { %vm2158_vm15 = vc.u32 %v2150_v47, %v2154_v52  ;;  %v2160_v40 = vadd.s32 %v2154_v52, %v2150_v47  ;;  %vm1977_vm14 = vcmp.lt.s32.totalorder %v4027_v8, 4  ;;  %v2178_v53 = vshll.u32 %v2174_v16, 16 }
 0x343   : > { %v2159_v63 = vsel %vm2158_vm15, 1, %v4514_v36  ;;  %vm2180_vm1 = vc.u32 %v2172_v38, %v2176_v55  ;;  %v2182_v30 = vadd.s32 %v2176_v55, %v2172_v38  ;;  %v2269_v35 = vshll.u32 %v4508_v33, %v4059_v31 }
 0x344   : > { %v2161_v5 = vadd.s32 %v2159_v63, %v2153_v60  ;;  %vm2162_vm9 = vc.u32 %v2160_v40, %v2156_v18  ;;  %v2181_v0 = vsel %vm2180_vm1, 1, %v4514_v36  ;;  %v2260_v43 = vor.u32 8388608, %v2259_v2 }
 0x345   : > { %v2163_v22 = vsel %vm2162_vm9, 1, %v4514_v36  ;;  %v2183_v19 = vadd.s32 %v2181_v0, %v2175_v50  ;;  %vm2184_vm10 = vc.u32 %v2182_v30, %v2178_v53  ;;  %v2270_v48 = vshrl.u32 %v4534_v61, %v4069_v13 }
 0x346   : > { %v2165_v54 = vadd.s32 %v2163_v22, %v2161_v5  ;;  %v2185_v47 = vsel %vm2184_vm10, 1, %v4514_v36  ;;  %v2272_v55 = vshll.u32 %v4534_v61, %v4059_v31  ;;  %vm1976_vm0 = vcmp.lt.s32.totalorder %v4027_v8, 3 }
 0x347   : > { %v2187_v18 = vadd.s32 %v2185_v47, %v2183_v19  ;;  %v2273_v60 = vshrl.u32 %v4532_v17, %v4069_v13  ;;  %v2275_v52 = vshll.u32 %v4532_v17, %v4059_v31  ;;  %v2276_v5 = vshrl.u32 %v4533_v15, %v4069_v13 }
 0x348   : > { %v2166_v38 = vadd.s32 %v2165_v54, %v2155_v56  ;;  %v2179_v50 = vshrl.u32 %v2174_v16, 16  ;;  %v4132_v40 = vadd.s32 %v2182_v30, %v2178_v53  ;;  %v2271_v2 = vor.u32 %v2270_v48, %v2269_v35 }
 0x349   : > { %v2188_v63 = vadd.s32 %v2187_v18, %v2177_v49  ;;  %v4134_v0 = vor.u32 %v2273_v60, %v2272_v55  ;;  %v2277_v61 = vor.u32 %v2276_v5, %v2275_v52  ;;  %vm2284_vm4 = vcmp.lt.s32.totalorder %v4063_v51, 1 }
 0x34a   : > { %v4137_v22 = vadd.s32 %v2166_v38, %v2157_v24  ;;  %vm2285_vm6 = vcmp.lt.s32.totalorder %v4063_v51, 2  ;;  %vm2286_vm8 = vcmp.lt.s32.totalorder %v4063_v51, 3  ;;  %v4141_v17 = vshll.u32 %v2260_v43, 8 }
 0x34b   : > { %v2189_v15 = vadd.s32 %v2188_v63, %v2179_v50  ;;  %v2292_v56 = vsel %vm2284_vm4, %v2271_v2, %v4134_v0  ;;  %v2294_v31 = vsel %vm2286_vm8, %v2277_v61, %v2293_v29  ;;  %v2298_v16 = vsel %vm2286_vm8, %v4094_v37, %v2297_v9 }
 0x34c   : > { %v1983_v24 = vsel %vm1977_vm14, %v4048_v28, 920167782  ;;  %v4535_v49 = vor.u32 %v4040_v46, %v4036_v21  ;;  %vm2192_vm5 = vc.u32 %v4137_v22, %v4132_v40  ;;  %v2295_v29 = vsel %vm2285_vm6, %v2292_v56, %v2294_v31 }
 0x34d   : > { %vm1975_vm11 = vcmp.lt.s32.totalorder %v4027_v8, 2  ;;  %v2190_v37 = vmul.u32 %v4079_v44, %v4108_v3  ;;  %v2193_v9 = vadd.s32 1, %v2189_v15  ;;  %v2296_v30 = vsel %vm2284_vm4, %v4134_v0, %v2277_v61 }
 0x34e   : > { %v1987_v53 = vsel %vm1977_vm14, %v4535_v49, 1326507024  ;;  %v2301_v21 = vand.u32 65535, %v4141_v17  ;;  %v2299_v46 = vsel %vm2285_vm6, %v2296_v30, %v2298_v16  ;;  %v2302_v35 = vshrl.u32 %v4141_v17, 16 }
 0x34f   : > { %v2325_v19 = vand.u32 65535, %v2295_v29  ;;  %v2326_v43 = vshrl.u32 %v2295_v29, 16  ;;  %v1986_v54 = vsel %vm1974_vm7, %v4044_v58, %v4046_v59  ;;  %v2194_v44 = vsel %vm2192_vm5, %v2193_v9, %v2189_v15 }
 0x350   : > { %v2303_v3 = vand.u32 65535, %v2299_v46  ;;  %v2304_v47 = vshrl.u32 %v2299_v46, 16  ;;  %v1984_v48 = vsel %vm1976_vm0, %v4046_v59, %v1983_v24  ;;  %v2195_v55 = vadd.s32 %v2194_v44, %v2190_v37 }
 0x351   : > { %v2328_v18 = vmul.u32 %v2326_v43, %v2301_v21  ;;  %v2329_v60 = vmul.u32 %v2325_v19, %v2302_v35  ;;  %v1988_v52 = vsel %vm1976_vm0, %v4048_v28, %v1987_v53  ;;  %v2268_v5 = vshrl.u32 %v4508_v33, %v4069_v13 }
 0x352   : > { %v2306_v38 = vmul.u32 %v2304_v47, %v2301_v21  ;;  %v2307_v50 = vmul.u32 %v2303_v3, %v2302_v35  ;;  %v4536_v63 = vshll.u32 %v3996_v57, 16  ;;  %v2196_v56 = vadd.s32 536870912, %v2195_v55 }
 0x353   : > { %v2289_v31 = vsel %vm2287_vm2, %v2277_v61, 2102212464  ;;  %v2327_v16 = vmul.u32 %v2325_v19, %v2301_v21  ;;  %v2331_v24 = vshll.u32 %v2328_v18, 16  ;;  %v2305_v49 = vmul.u32 %v2303_v3, %v2301_v21 }
 0x354   : > { %vm4188_vm12 = vc.u32 %v4006_v11, %v4536_v63  ;;  %v2308_v28 = vmul.u32 %v2304_v47, %v2302_v35  ;;  %v2309_v53 = vshll.u32 %v2306_v38, 16  ;;  %v2330_v29 = vmul.u32 %v2326_v43, %v2302_v35 }
 0x355   : > { %v4194_v13 = vshrl.u32 %v2196_v56, 30  ;;  %v2311_v37 = vshll.u32 %v2307_v50, 16  ;;  %v2333_v9 = vshll.u32 %v2329_v60, 16  ;;  %vm2335_vm3 = vc.u32 %v2327_v16, %v2331_v24 }
 0x356   : > { %vm2313_vm15 = vc.u32 %v2305_v49, %v2309_v53  ;;  %v2315_v30 = vadd.s32 %v2309_v53, %v2305_v49  ;;  %v2336_v46 = vsel %vm2335_vm3, 1, %v4514_v36  ;;  %v2337_v44 = vadd.s32 %v2331_v24, %v2327_v16 }
 0x357   : > { %v4199_v63 = vsel %vm1975_vm11, %v1986_v54, %v1988_v52  ;;  %v2198_v61 = vshll.u32 %v4194_v13, 30  ;;  %v2314_v21 = vsel %vm2313_vm15, 1, %v4514_v36  ;;  %v2338_v19 = vadd.s32 %v2336_v46, %v2330_v29 }
 0x358   : > { %v2288_v35 = vsel %vm2284_vm4, %v2268_v5, %v2271_v2  ;;  %v2316_v43 = vadd.s32 %v2314_v21, %v2308_v28  ;;  %vm2317_vm2 = vc.u32 %v2315_v30, %v2311_v37  ;;  %vm2339_vm1 = vc.u32 %v2337_v44, %v2333_v9 }
 0x359   : > { %v2199_v3 = vsub.s32 %v2195_v55, %v2198_v61  ;;  %v2290_v47 = vsel %vm2286_vm8, %v4134_v0, %v2289_v31  ;;  %v2318_v56 = vsel %vm2317_vm2, 1, %v4514_v36  ;;  %v2340_v54 = vsel %vm2339_vm1, 1, %v4514_v36 }
 0x35a   : > { %v2310_v52 = vshrl.u32 %v2306_v38, 16  ;;  %v2320_v16 = vadd.s32 %v2318_v56, %v2316_v43  ;;  %v2332_v24 = vshrl.u32 %v2328_v18, 16  ;;  %v2342_v49 = vadd.s32 %v2340_v54, %v2338_v19 }
 0x35b   : > { %v1994_v53 = vshrl.u32 %v4199_v63, 16  ;;  %vm2200_vm9 = vcmp.lt.s32.totalorder %v2199_v3, 0  ;;  %v2201_v2 = vsub.s32 0, %v2199_v3  ;;  %v2312_v5 = vshrl.u32 %v2307_v50, 16 }
 0x35c   : > { %v2321_v28 = vadd.s32 %v2320_v16, %v2310_v52  ;;  %v2334_v29 = vshrl.u32 %v2329_v60, 16  ;;  %v2343_v55 = vadd.s32 %v2342_v49, %v2332_v24  ;;  %v4539_v37 = vand.u32 65535, %v3970_v45 }
 0x35d   : > { %v4540_v31 = vshll.u32 %v3996_v57, 16  ;;  %v2202_v38 = vsel %vm2200_vm9, %v2201_v2, %v2199_v3  ;;  %v2291_v18 = vsel %vm2285_vm6, %v2288_v35, %v2290_v47  ;;  %v4219_v46 = vadd.s32 %v2337_v44, %v2333_v9 }
 0x35e   : > { %v1842_v0 = vmul.u32 %v4539_v37, %v3991_v34  ;;  %v2203_v61 = vclz %v2202_v38  ;;  %v4221_v21 = vadd.s32 %v2321_v28, %v2312_v5  ;;  %v2344_v50 = vadd.s32 %v2343_v55, %v2334_v29 }
 0x35f   : > { %v1850_v30 = vadd.s32 %v4540_v31, %v4006_v11  ;;  %v1849_v60 = vsel %vm4188_vm12, 1, %v4514_v36  ;;  %v4229_v45 = vsel %vm1975_vm11, %v4092_v6, %v1984_v48  ;;  %v1993_v11 = vand.u32 65535, %v4199_v63 }
 0x360   : > { %v4235_v51 = vmul.u32 %v1994_v53, %v4000_v23  ;;  %v1846_v9 = vshll.u32 %v1842_v0, 16  ;;  %v2569_v44 = vadd.s32 4294967294, %v2203_v61  ;;  %v2345_v19 = vmul.u32 %v4141_v17, %v2291_v18 }
 0x361   : > { %vm2347_vm10 = vc.u32 %v4221_v21, %v4219_v46  ;;  %v2348_v15 = vadd.s32 1, %v2344_v50  ;;  %v1851_v35 = vadd.s32 %v1849_v60, %v4009_v42  ;;  %v4541_v6 = vand.u32 65535, %v3972_v25 }
 0x362   : > { %vm1852_vm4 = vc.u32 %v1850_v30, %v1846_v9  ;;  %v1866_v43 = vshll.u32 %v4012_v20, 16  ;;  %v2191_v47 = vadd.s32 %v4132_v40, %v4137_v22  ;;  %vm2570_vm6 = vcmp.lt.s32.totalorder %v2569_v44, 0 }
 0x363   : > { %v1864_v48 = vmul.u32 %v4541_v6, %v3991_v34  ;;  %v2349_v56 = vsel %vm2347_vm10, %v2348_v15, %v2344_v50  ;;  %v1853_v17 = vsel %vm1852_vm4, 1, %v4514_v36  ;;  %v2206_v54 = vsel %vm2570_vm6, 0, %v2569_v44 }
 0x364   : > { %v2350_v52 = vadd.s32 %v2349_v56, %v2345_v19  ;;  %v1855_v16 = vadd.s32 %v1853_v17, %v1851_v35  ;;  %v4542_v42 = vmov %v4541_v6  ;;  %v2207_v49 = vsub.s32 32, %v2206_v54 }
 0x365   : > { %v1862_v24 = vmul.u32 %v4542_v42, %v3986_v39  ;;  %v2211_v2 = vsub.s32 4294967266, %v2206_v54  ;;  %v1845_v34 = vshrl.u32 %v3996_v57, 16  ;;  %v1868_v5 = vshll.u32 %v1864_v48, 16 }
 0x366   : > { %v2208_v28 = vshll.u32 %v2199_v3, %v2206_v54  ;;  %v2351_v29 = vadd.s32 536870912, %v2350_v52  ;;  %v2209_v22 = vshrl.u32 %v2191_v47, %v2207_v49  ;;  %v1999_v30 = vshll.u32 %v4235_v51, 16 }
 0x367   : > { %vm1870_vm8 = vc.u32 %v1862_v24, %v1866_v43  ;;  %v1872_v40 = vadd.s32 %v1866_v43, %v1862_v24  ;;  %v2212_v55 = vadd.s32 127, %v2211_v2  ;;  %v1856_v37 = vadd.s32 %v1855_v16, %v1845_v34 }
 0x368   : > { %v1871_v31 = vsel %vm1870_vm8, 1, %v4514_v36  ;;  %v4254_v38 = vshrl.u32 %v2351_v29, 30  ;;  %v2210_v39 = vor.u32 %v2209_v22, %v2208_v28  ;;  %v1847_v57 = vshrl.u32 %v1842_v0, 16 }
 0x369   : > { %v1873_v25 = vadd.s32 %v1871_v31, %v4015_v10  ;;  %vm1874_vm5 = vc.u32 %v1872_v40, %v1868_v5  ;;  %v2213_v18 = vshll.u32 %v2212_v55, 23  ;;  %v1992_v61 = vshrl.u32 %v3979_v62, 16 }
 0x36a   : > { %v1875_v3 = vsel %vm1874_vm5, 1, %v4514_v36  ;;  %v2353_v50 = vshll.u32 %v4254_v38, 30  ;;  %v1867_v60 = vshrl.u32 %v4012_v20, 16  ;;  %v1995_v44 = vmul.u32 %v1993_v11, %v4000_v23 }
 0x36b   : > { %v1877_v9 = vadd.s32 %v1875_v3, %v1873_v25  ;;  %v2016_v19 = vshrl.u32 %v4229_v45, 16  ;;  %v2214_v15 = vor.u32 4788187, %v2213_v18  ;;  %v4263_v35 = vadd.s32 %v1856_v37, %v1847_v57 }
 0x36c   : > { %v4265_v10 = vsub.s32 %v2350_v52, %v2353_v50  ;;  %v1869_v6 = vshrl.u32 %v1864_v48, 16  ;;  %v4267_v43 = vmul.u32 %v1993_v11, %v1992_v61  ;;  %vm2003_vm12 = vc.u32 %v1995_v44, %v1999_v30 }
 0x36d   : > { %v1878_v0 = vadd.s32 %v1877_v9, %v1867_v60  ;;  %v2215_v47 = vand.u32 2147483647, %v2214_v15  ;;  %v2217_v56 = vcvt.s32.f32 %v2210_v39  ;;  %v4269_v17 = vadd.s32 %v1872_v40, %v1868_v5 }
 0x36e   : > { %v2005_v20 = vadd.s32 %v1999_v30, %v1995_v44  ;;  %vm2355_vm3 = vcmp.lt.s32.totalorder %v4265_v10, 0  ;;  %v2356_v54 = vsub.s32 0, %v4265_v10  ;;  %v2015_v42 = vand.u32 65535, %v4229_v45 }
 0x36f   : > { %v1879_v16 = vadd.s32 %v1878_v0, %v1869_v6  ;;  %v4275_v52 = vmul.u32 %v2016_v19, %v4000_v23  ;;  %v2218_v48 = vmul.f32 %v2217_v56, %v2215_v47  ;;  %vm1882_vm15 = vc.u32 %v4263_v35, %v4269_v17 }
 0x370   : > { %v2357_v11 = vsel %vm2355_vm3, %v2356_v54, %v4265_v10  ;;  %v2001_v49 = vshll.u32 %v4267_v43, 16  ;;  %v2004_v2 = vsel %vm2003_vm12, 1, %v4514_v36  ;;  %v1998_v34 = vmul.u32 %v1994_v53, %v1992_v61 }
 0x371   : > { %v1883_v24 = vadd.s32 1, %v1879_v16  ;;  %vm2099_vm2 = vcmp.lt.s32.totalorder %v3962_v14, 0  ;;  %v2219_v45 = vxor.u32 2147483648, %v2218_v48  ;;  %v2358_v5 = vclz %v2357_v11 }
 0x372   : > { %v1958_v28 = vshrl.u32 %v4508_v33, %v3988_v32  ;;  %v4543_v29 = vand.u32 2147483647, %v3962_v14  ;;  %vm2007_vm9 = vc.u32 %v2005_v20, %v2001_v49  ;;  %v4546_v53 = vmul.u32 %v3974_v1, %v3976_v7 }
 0x373   : > { %v1884_v22 = vsel %vm1882_vm15, %v1883_v24, %v1879_v16  ;;  %v2220_v55 = vsel %vm2099_vm2, %v2219_v45, %v2218_v48  ;;  %v2572_v63 = vadd.s32 4294967294, %v2358_v5  ;;  %v2006_v31 = vadd.s32 %v2004_v2, %v1998_v34 }
 0x374   : > { %vm4289_vm1 = vcmp.le.f32.partialorder %v4543_v29, 0.7853982  ;;  %v1885_v37 = vadd.s32 %v1884_v22, %v4546_v53  ;;  %v2017_v32 = vmul.u32 %v2015_v42, %v4000_v23  ;;  %v2019_v30 = vmul.u32 %v2015_v42, %v1992_v61 }
 0x375   : > { %v4301_v33 = vsel %vm4289_vm1, %v3962_v14, %v2220_v55  ;;  %v2021_v25 = vshll.u32 %v4275_v52, 16  ;;  %vm2573_vm10 = vcmp.lt.s32.totalorder %v2572_v63, 0  ;;  %v2008_v1 = vsel %vm2007_vm9, 1, %v4514_v36 }
 0x376   : > { %v4307_v39 = vmul.f32 %v4301_v33, %v4301_v33  ;;  %v1886_v18 = vadd.s32 536870912, %v1885_v37  ;;  %v1978_v7 = vsel %vm1974_vm7, %v1958_v28, %v4033_v27  ;;  %v1979_v57 = vsel %vm1977_vm14, %v4046_v59, 2102212464 }
 0x377   : > { %v2361_v23 = vsel %vm2573_vm10, 0, %v2572_v63  ;;  %vm2025_vm4 = vc.u32 %v2017_v32, %v2021_v25  ;;  %v2020_v3 = vmul.u32 %v2016_v19, %v1992_v61  ;;  %v2346_v60 = vadd.s32 %v4219_v46, %v4221_v21 }
 0x378   : > { %v2233_v50 = vmul.f32 -0.00019511016, %v4307_v39  ;;  %v2362_v9 = vsub.s32 32, %v2361_v23  ;;  %v2366_v44 = vsub.s32 4294967266, %v2361_v23  ;;  %v4319_v15 = vshrl.u32 %v1886_v18, 30 }
 0x379   : > { %v2010_v6 = vadd.s32 %v2008_v1, %v2006_v31  ;;  %v2026_v0 = vsel %vm2025_vm4, 1, %v4514_v36  ;;  %v2023_v56 = vshll.u32 %v2019_v30, 16  ;;  %v2027_v20 = vadd.s32 %v2021_v25, %v2017_v32 }
 0x37a   : > { %v2234_v27 = vadd.f32 0.008332121, %v2233_v50  ;;  %v2364_v47 = vshrl.u32 %v2346_v60, %v2362_v9  ;;  %v1980_v59 = vsel %vm1976_vm0, %v4044_v58, %v1979_v57  ;;  %v2363_v61 = vshll.u32 %v4265_v10, %v2361_v23 }
 0x37b   : > { %v2367_v19 = vadd.s32 127, %v2366_v44  ;;  %v1888_v46 = vshll.u32 %v4319_v15, 30  ;;  %v2226_v21 = vmul.f32 -0.001358992, %v4307_v39  ;;  %v2000_v54 = vshrl.u32 %v4235_v51, 16 }
 0x37c   : > { %v2028_v16 = vadd.s32 %v2026_v0, %v2020_v3  ;;  %vm2029_vm7 = vc.u32 %v2027_v20, %v2023_v56  ;;  %v2365_v42 = vor.u32 %v2364_v47, %v2363_v61  ;;  %v1981_v49 = vsel %vm1975_vm11, %v1978_v7, %v1980_v59 }
 0x37d   : > { %v2368_v48 = vshll.u32 %v2367_v19, 23  ;;  %v1889_v11 = vsub.s32 %v1885_v37, %v1888_v46  ;;  %v2030_v24 = vsel %vm2029_vm7, 1, %v4514_v36  ;;  %v2235_v58 = vmul.f32 %v2234_v27, %v4307_v39 }
 0x37e   : > { %v2011_v10 = vadd.s32 %v2010_v6, %v2000_v54  ;;  %v2221_v2 = vsub.s32 4, %v4194_v13  ;;  %v2227_v5 = vadd.f32 0.041655596, %v2226_v21  ;;  %v2002_v51 = vshrl.u32 %v4267_v43, 16 }
 0x37f   : > { %v2369_v34 = vor.u32 4788187, %v2368_v48  ;;  %vm1890_vm14 = vcmp.lt.s32.totalorder %v1889_v11, 0  ;;  %v1891_v45 = vsub.s32 0, %v1889_v11  ;;  %v2022_v28 = vshrl.u32 %v4275_v52, 16 }
 0x380   : > { %v2032_v29 = vadd.s32 %v2030_v24, %v2028_v16  ;;  %v2372_v55 = vcvt.s32.f32 %v2365_v42  ;;  %v2024_v63 = vshrl.u32 %v2019_v30, 16  ;;  %v2236_v8 = vadd.f32 -0.16666654, %v2235_v58 }
 0x381   : > { %v2370_v22 = vand.u32 2147483647, %v2369_v34  ;;  %v1892_v36 = vsel %vm1890_vm14, %v1891_v45, %v1889_v11  ;;  %v4336_v37 = vadd.s32 %v2011_v10, %v2002_v51  ;;  %v2228_v25 = vmul.f32 %v2227_v5, %v4307_v39 }
 0x382   : > { %v1893_v53 = vclz %v1892_v36  ;;  %v2033_v31 = vadd.s32 %v2032_v29, %v2022_v28  ;;  %v4339_v1 = vadd.s32 %v2027_v20, %v2023_v56  ;;  %v2035_v43 = vmul.u32 %v3979_v62, %v1981_v49 }
 0x383   : > { %v2373_v32 = vmul.f32 %v2372_v55, %v2370_v22  ;;  %v2222_v52 = vsel %vm2099_vm2, %v2221_v2, %v4194_v13  ;;  %vm2254_vm0 = vcmp.lt.s32.totalorder %v3981_v41, 0  ;;  %v2237_v57 = vmul.f32 %v2236_v8, %v4307_v39 }
 0x384   : > { %v2563_v18 = vadd.s32 4294967294, %v1893_v53  ;;  %v2034_v7 = vadd.s32 %v2033_v31, %v2024_v63  ;;  %vm2037_vm6 = vc.u32 %v4336_v37, %v4339_v1  ;;  %vm4351_vm8 = vcmp.le.f32.partialorder %v2252_v4, 0.7853982 }
 0x385   : > { %v2374_v30 = vxor.u32 2147483648, %v2373_v32  ;;  %v2376_v13 = vsub.s32 4, %v4254_v38  ;;  %v2229_v60 = vadd.f32 -0.4999988, %v2228_v25  ;;  %v1881_v44 = vadd.s32 %v4269_v17, %v4263_v35 }
 0x386   : > { %vm2564_vm11 = vcmp.lt.s32.totalorder %v2563_v18, 0  ;;  %v2038_v23 = vadd.s32 1, %v2034_v7  ;;  %v2224_v4 = vsel %vm4289_vm1, 0, %v2222_v52  ;;  %v2238_v56 = vadd.f32 1.0, %v2237_v57 }
 0x387   : > { %v2375_v62 = vsel %vm2254_vm0, %v2374_v30, %v2373_v32  ;;  %v1896_v50 = vsel %vm2564_vm11, 0, %v2563_v18  ;;  %v2230_v54 = vmul.f32 %v2229_v60, %v4307_v39  ;;  %v2241_v16 = vadd.s32 3, %v2224_v4 }
 0x388   : > { %v2378_v9 = vsel %vm4351_vm8, %v3981_v41, %v2375_v62  ;;  %v1897_v6 = vsub.s32 32, %v1896_v50  ;;  %v1901_v27 = vsub.s32 4294967266, %v1896_v50  ;;  %v2039_v47 = vsel %vm2037_vm6, %v2038_v23, %v2034_v7 }
 0x389   : > { %v2380_v0 = vmul.f32 %v2378_v9, %v2378_v9  ;;  %v2040_v59 = vadd.s32 %v2039_v47, %v2035_v43  ;;  %v1898_v46 = vshll.u32 %v1889_v11, %v1896_v50  ;;  %v2377_v35 = vsel %vm2254_vm0, %v2376_v13, %v4254_v38 }
 0x38a   : > { %v1899_v20 = vshrl.u32 %v1881_v44, %v1897_v6  ;;  %v1902_v21 = vadd.s32 127, %v1901_v27  ;;  %v2239_v49 = vmul.f32 %v2238_v56, %v4301_v33  ;;  %v2379_v11 = vsel %vm4351_vm8, 0, %v2377_v35 }
 0x38b   : > { %v2381_v61 = vmul.f32 -0.001358992, %v2380_v0  ;;  %v2388_v19 = vmul.f32 -0.00019511016, %v2380_v0  ;;  %v2041_v17 = vadd.s32 536870912, %v2040_v59  ;;  %v2231_v34 = vadd.f32 1.0, %v2230_v54 }
 0x38c   : > { %v1900_v48 = vor.u32 %v1899_v20, %v1898_v46  ;;  %v1903_v24 = vshll.u32 %v1902_v21, 23  ;;  %v2242_v45 = vand.u32 3, %v2241_v16  ;;  %v2245_v22 = vxor.u32 2147483648, %v2239_v49 }
 0x38d   : > { %v2382_v40 = vadd.f32 0.041655596, %v2381_v61  ;;  %v2389_v42 = vadd.f32 0.008332121, %v2388_v19  ;;  %v4370_v58 = vshrl.u32 %v2041_v17, 30  ;;  %v2396_v55 = vadd.s32 3, %v2379_v11 }
 0x38e   : > { %v1904_v39 = vor.u32 4788187, %v1903_v24  ;;  %v1907_v29 = vcvt.s32.f32 %v1900_v48  ;;  %vm1789_vm5 = vcmp.lt.s32.totalorder %v3944_v26, 0  ;;  %vm2244_vm12 = vcmp.eq.s32.totalorder %v2242_v45, 0 }
 0x38f   : > { %v2383_v10 = vmul.f32 %v2382_v40, %v2380_v0  ;;  %v2390_v2 = vmul.f32 %v2389_v42, %v2380_v0  ;;  %v2043_v5 = vshll.u32 %v4370_v58, 30  ;;  %v2248_v31 = vxor.u32 2147483648, %v2231_v34 }
 0x390   : > { %v1905_v28 = vand.u32 2147483647, %v1904_v39  ;;  %v2246_v7 = vsel %vm2244_vm12, %v2231_v34, %v2245_v22  ;;  %v2397_v43 = vand.u32 3, %v2396_v55  ;;  %v4549_v52 = vand.u32 2147483647, %v3944_v26 }
 0x391   : > { %v2384_v38 = vadd.f32 -0.4999988, %v2383_v10  ;;  %v2391_v51 = vadd.f32 -0.16666654, %v2390_v2  ;;  %v2044_v36 = vsub.s32 %v2040_v59, %v2043_v5  ;;  %vm2243_vm2 = vcmp.lt.s32.totalorder %v2242_v45, 2 }
 0x392   : > { %v1908_v8 = vmul.f32 %v1907_v29, %v1905_v28  ;;  %vm4378_vm15 = vcmp.le.f32.partialorder %v4549_v52, 0.7853982  ;;  %vm2247_vm1 = vcmp.eq.s32.totalorder %v2242_v45, 2  ;;  %vm2240_vm9 = vweird.f32 %v3962_v14 }
 0x393   : > { %v2385_v33 = vmul.f32 %v2384_v38, %v2380_v0  ;;  %v2392_v63 = vmul.f32 %v2391_v51, %v2380_v0  ;;  %vm2045_vm3 = vcmp.lt.s32.totalorder %v2044_v36, 0  ;;  %v2046_v53 = vsub.s32 0, %v2044_v36 }
 0x394   : > { %v1909_v18 = vxor.u32 2147483648, %v1908_v8  ;;  %v2249_v60 = vsel %vm2247_vm1, %v2248_v31, %v2239_v49  ;;  %vm2399_vm10 = vcmp.eq.s32.totalorder %v2397_v43, 0  ;;  %vm2402_vm4 = vcmp.eq.s32.totalorder %v2397_v43, 2 }
 0x395   : > { %v2386_v32 = vadd.f32 1.0, %v2385_v33  ;;  %v2393_v25 = vadd.f32 1.0, %v2392_v63  ;;  %v2047_v57 = vsel %vm2045_vm3, %v2046_v53, %v2044_v36  ;;  %v2250_v0 = vsel %vm2243_vm2, %v2246_v7, %v2249_v60 }
 0x396   : > { %v1910_v62 = vsel %vm1789_vm5, %v1909_v18, %v1908_v8  ;;  %v2048_v13 = vclz %v2047_v57  ;;  %vm2398_vm7 = vcmp.lt.s32.totalorder %v2397_v43, 2  ;;  %vm2395_vm0 = vweird.f32 %v3981_v41 }
 0x397   : > { %v2394_v23 = vmul.f32 %v2393_v25, %v2378_v9  ;;  %v2403_v3 = vxor.u32 2147483648, %v2386_v32  ;;  %v1913_v50 = vsel %vm4378_vm15, %v3944_v26, %v1910_v62  ;;  %v2251_v59 = vsel %vm2240_vm9, nan, %v2250_v0 }
 0x398   : > { %v1915_v6 = vmul.f32 %v1913_v50, %v1913_v50  ;;  %v2566_v4 = vadd.s32 4294967294, %v2048_v13  ;;  %v2036_v19 = vadd.s32 %v4339_v1, %v4336_v37  ;;  %v1911_v37 = vsub.s32 4, %v4319_v15 }
 0x399   : > { %v2400_v44 = vxor.u32 2147483648, %v2394_v23  ;;  %v2404_v27 = vsel %vm2402_vm4, %v2403_v3, %v2394_v23  ;;  %vm1944_vm11 = vcmp.lt.s32.totalorder %v3947_v12, 0  ;;  %v4552_v5 = vand.u32 2147483647, %v3947_v12 }
 0x39a   : > { %vm2567_vm14 = vcmp.lt.s32.totalorder %v2566_v4, 0  ;;  %v1923_v56 = vmul.f32 -0.00019511016, %v1915_v6  ;;  %v1916_v40 = vmul.f32 -0.001358992, %v1915_v6  ;;  %v1912_v28 = vsel %vm1789_vm5, %v1911_v37, %v4319_v15 }
 0x39b   : > { %v2401_v9 = vsel %vm2399_vm10, %v2386_v32, %v2400_v44  ;;  %v2051_v20 = vsel %vm2567_vm14, 0, %v2566_v4  ;;  %vm4395_vm6 = vcmp.le.f32.partialorder %v4552_v5, 0.7853982  ;;  %v2066_v29 = vsub.s32 4, %v4370_v58 }
 0x39c   : > { %v2405_v47 = vsel %vm2398_vm7, %v2401_v9, %v2404_v27  ;;  %v2052_v46 = vsub.s32 32, %v2051_v20  ;;  %v2056_v14 = vsub.s32 4294967266, %v2051_v20  ;;  %v1924_v16 = vadd.f32 0.008332121, %v1923_v56 }
 0x39d   : > { %v2406_v61 = vsel %vm2395_vm0, nan, %v2405_v47  ;;  %v2053_v35 = vshll.u32 %v2044_v36, %v2051_v20  ;;  %v1917_v49 = vadd.f32 0.041655596, %v1916_v40  ;;  %v1914_v33 = vsel %vm4378_vm15, 0, %v1912_v28 }
 0x39e   : > { %v2409_v21 = vpack.c.bf16 %v2406_v61, %v2251_v59  ;;  %v2054_v54 = vshrl.u32 %v2036_v19, %v2052_v46  ;;  %v2057_v17 = vadd.s32 127, %v2056_v14  ;;  %v1925_v41 = vmul.f32 %v1924_v16, %v1915_v6  ;;  %v2407_v16 = vld [vmem:[%s4456_s7] sm:$0x3] }
 0x39f   : > { %v1918_v1 = vmul.f32 %v1917_v49, %v1915_v6  ;;  %v2067_v31 = vsel %vm1944_vm11, %v2066_v29, %v4370_v58  ;;  %v1931_v15 = vadd.s32 3, %v1914_v33  ;;  %vm1930_vm1 = vweird.f32 %v3944_v26 }
 0x3a0   : > { %2425 = vmatpush.bf16.msra.mxu2 %v2409_v21  ;;  %v2055_v42 = vor.u32 %v2054_v54, %v2053_v35  ;;  %v2058_v48 = vshll.u32 %v2057_v17, 23  ;;  %v1926_v2 = vadd.f32 -0.16666654, %v1925_v41  ;;  %v2069_v43 = vsel %vm4395_vm6, 0, %v2067_v31  ;;  %v2414_v35 = vpop.permute.xlu1 %2413 }
 0x3a1   : > { %v1919_v55 = vadd.f32 -0.4999988, %v1918_v1  ;;  %v1932_v30 = vand.u32 3, %v1931_v15  ;;  %v2086_v13 = vadd.s32 3, %v2069_v43  ;;  %vm2085_vm9 = vweird.f32 %v3947_v12 }
 0x3a2   : > { %v2059_v24 = vor.u32 4788187, %v2058_v48  ;;  %v2062_v10 = vcvt.s32.f32 %v2055_v42  ;;  %v1927_v45 = vmul.f32 %v1926_v2, %v1915_v6 }
 0x3a3   : > { %v1920_v32 = vmul.f32 %v1919_v55, %v1915_v6  ;;  %vm1934_vm8 = vcmp.eq.s32.totalorder %v1932_v30, 0  ;;  %v2087_v9 = vand.u32 3, %v2086_v13  ;;  %vm1937_vm5 = vcmp.eq.s32.totalorder %v1932_v30, 2 }
 0x3a4   : > { %v2060_v11 = vand.u32 2147483647, %v2059_v24  ;;  %v1928_v63 = vadd.f32 1.0, %v1927_v45  ;;  %vm1933_vm12 = vcmp.lt.s32.totalorder %v1932_v30, 2 }
 0x3a5   : > { %v1921_v23 = vadd.f32 1.0, %v1920_v32  ;;  %vm2089_vm3 = vcmp.eq.s32.totalorder %v2087_v9, 0  ;;  %vm2092_vm15 = vcmp.eq.s32.totalorder %v2087_v9, 2  ;;  %vm2088_vm2 = vcmp.lt.s32.totalorder %v2087_v9, 2 }
 0x3a6   : > { %v2063_v39 = vmul.f32 %v2062_v10, %v2060_v11  ;;  %v1929_v7 = vmul.f32 %v1928_v63, %v1913_v50 }
 0x3a7   : > { %v1938_v0 = vxor.u32 2147483648, %v1921_v23 }
 0x3a8   : > { %v2064_v34 = vxor.u32 2147483648, %v2063_v39  ;;  %v1935_v60 = vxor.u32 2147483648, %v1929_v7 }
 0x3a9   : > { %v1939_v56 = vsel %vm1937_vm5, %v1938_v0, %v1929_v7 }
 0x3aa   : > { %v2065_v51 = vsel %vm1944_vm11, %v2064_v34, %v2063_v39  ;;  %v1936_v27 = vsel %vm1934_vm8, %v1921_v23, %v1935_v60 }
 0x3ab   : > { %v2068_v22 = vsel %vm4395_vm6, %v3947_v12, %v2065_v51  ;;  %v1940_v59 = vsel %vm1933_vm12, %v1936_v27, %v1939_v56 }
 0x3ac   : > { %v2070_v36 = vmul.f32 %v2068_v22, %v2068_v22  ;;  %v1941_v21 = vsel %vm1930_vm1, nan, %v1940_v59 }
 0x3ae   : > { %v2071_v8 = vmul.f32 -0.001358992, %v2070_v36  ;;  %v2078_v53 = vmul.f32 -0.00019511016, %v2070_v36 }
 0x3b0   : > { %v2072_v25 = vadd.f32 0.041655596, %v2071_v8  ;;  %v2079_v18 = vadd.f32 0.008332121, %v2078_v53 }
 0x3b2   : > { %v2073_v52 = vmul.f32 %v2072_v25, %v2070_v36  ;;  %v2080_v57 = vmul.f32 %v2079_v18, %v2070_v36 }
 0x3b4   : > { %v2074_v3 = vadd.f32 -0.4999988, %v2073_v52  ;;  %v2081_v62 = vadd.f32 -0.16666654, %v2080_v57 }
 0x3b6   : > { %v2075_v44 = vmul.f32 %v2074_v3, %v2070_v36  ;;  %v2082_v4 = vmul.f32 %v2081_v62, %v2070_v36 }
 0x3b8   : > { %v2076_v58 = vadd.f32 1.0, %v2075_v44  ;;  %v2083_v6 = vadd.f32 1.0, %v2082_v4 }
 0x3ba   : > { %v2084_v50 = vmul.f32 %v2083_v6, %v2068_v22  ;;  %v2093_v47 = vxor.u32 2147483648, %v2076_v58 }
 0x3bc   : > { %v2090_v20 = vxor.u32 2147483648, %v2084_v50  ;;  %v2094_v19 = vsel %vm2092_vm15, %v2093_v47, %v2084_v50 }
 0x3be   : > { %v2091_v61 = vsel %vm2089_vm3, %v2076_v58, %v2090_v20 }
 0x3bf   : > { %v2095_v46 = vsel %vm2088_vm2, %v2091_v61, %v2094_v19 }
 0x3c0   : > { %v2096_v14 = vsel %vm2085_vm9, nan, %v2095_v46 }
 0x3c1   : > { %v2408_v54 = vpack.c.bf16 %v2096_v14, %v1941_v21 }
 0x3c3   : > { %2426 = vmatpush.bf16.msra.mxu2 %v2408_v54 }
 0x3c6   : > { %2574 = vmatmul.msk.bf16.vlgmr.msra.gmra.mxu2 %vm1076_vm13, %v2407_v16 }
 0x449   : > { %v2428_v17 = vpop.f32.mrf.mxu2 }
 0x44a   : > { %v2429_v40 = vadd.f32 %v2428_v17, %v2414_v35 }
 0x44c   : > { %v2432_v26 = vadd.f32 1.0, %v2429_v40 }
 0x44e   : > { %v2433_v12 = vmul.f32 0.5, %v2432_v26 }
 0x450   : > { %v2434_v42 = vmax.f32 %v2433_v12, 0.0 }
 0x451   : > { %v2430_v48 = vpop.f32.mrf.mxu2 }
 0x452   : > { %v2435_v41 = vmin.f32 %v2434_v42, 1.0 }
 0x454   : > { %2436 = vst [vmem:[%s323_s28] sm:$0x7] %v2435_v41 }
 0x455   : > { %2664 = shalt.err (!%p2661_p3)
}
 0x456   : > { %2585 = dma.vmem_to_hbm [thread:$0]  (%p2797_p5), %s2451_s29, 64, %s2453_s14, %s2438_s16  }
 0x457 PF: > { %p2591_p4 = scmp.ge.s32.totalorder %s2699_s12, 2  ;;  %s2464_s22 = sand.u32 1, %s2687_s30  }
 0x458   : > { %s2465_s27 = scalar_lea.sflag [#allocation3], %s2464_s22 }
 0x459   : > { %p2588_p7 = pnand %p2591_p4, %p2801_p6 }
 0x45b   : > { %p2589_p8 = pneg %p2588_p7 }
 0x45d   : > { %2682 = dma.done.wait (%p2589_p8), %s2465_s27, 64  }
 0x45e   : > { %2684 = vsyncadd (%p2589_p8), %s2465_s27, 4294967232  ;;  %p19_p9 = scmp.ge.s32.totalorder %s2784_s15, 4   ;;  %s4555_s30 = smov %s2691_s10 }
 0x45f   : > { %s4556_s10 = smov %s2695_s11  ;;  %s4557_s11 = smov %s2795_s18 }
 0x460   : > { %s4558_s12 = smov %s2784_s15  ;;  %21 = sbr.rel (!%p19_p9) target bundleno = 3 (0x3), region = 91 }
 0x465   :  { %2471 = vsyncpa [#allocation3], 1 }
 0x466   :  { %2473 = vsyncpa [#allocation3 + $0x1], 1 }

</bundles_post_ra>
